<compile_context>
chip_gen: v6e
topology: v6e:2x2x1
jax: 0.10.0
libtpu: 0.0.40
codegen_flags: <defaults>
</compile_context>

<pallas_src>
import jax
import jax.numpy as jnp
from jax import lax
from jax.experimental import pallas as pl
from jax.experimental.pallas import tpu as pltpu


# ---------------------------------------------------------------------------
# Pallas kernel: full sampling loop in one invocation
# ---------------------------------------------------------------------------
def sampler_kernel(coef_ref,            # SMEM scalar-prefetch: (n_iters, 7) f32
                   noise_ref,           # (C, B*T) initial noise (batch folded into lanes)
                   eps_ref,             # (n_iters, C, B*T) per-step ancestral noise
                   w1_ref, b1_ref, emb_ref, w2_ref, b2_ref,   # denoiser net params
                   out_ref):            # (C, B*T) output
    n_iters = eps_ref.shape[0]

    w1 = w1_ref[...]                    # (H, C)
    b1 = b1_ref[...]                    # (H, 1)
    emb = emb_ref[...]                  # (H, 1)
    w2 = w2_ref[...]                    # (C, H)
    b2 = b2_ref[...]                    # (C, 1)

    # x0 = sigmas[0] * noise
    x0 = coef_ref[0, 6] * noise_ref[...]            # (C, B*T)

    def body(i, x):
        c_skip    = coef_ref[i, 0]
        c_out     = coef_ref[i, 1]
        c_in      = coef_ref[i, 2]
        c_noise   = coef_ref[i, 3]
        step_coef = coef_ref[i, 4]                  # (sigma_down - sigma) / sigma
        sigma_up  = coef_ref[i, 5]

        # Fold per-step scalars into the tiny operands (32x4 / 4x32 / 32x1 mults)
        # instead of scaling the (C, B*T) activation slab.
        w1_eff = c_in * w1                          # (H, C)
        bias1  = b1 + c_noise * emb                 # (H, 1)
        w2_eff = c_out * w2                         # (C, H)
        bias2  = c_out * b2                         # (C, 1)

        # --- denoise_fn: KDiffusion preconditioning around the tiny net ---
        h = jnp.dot(w1_eff, x, preferred_element_type=jnp.float32) + bias1   # (H, B*T)
        h = jax.nn.gelu(h)                          # tanh approx (JAX default) -> EUP
        net_out = jnp.dot(w2_eff, h, preferred_element_type=jnp.float32) + bias2  # (C, B*T)
        x_denoised = c_skip * x + net_out

        # --- ancestral Euler update ---
        return x + (x - x_denoised) * step_coef + eps_ref[i] * sigma_up

    x = lax.fori_loop(0, n_iters, body, x0, unroll=True)

    # Final clamp in-register, single lane-dense store.
    out_ref[...] = jnp.clip(x, -1.0, 1.0)


# ---------------------------------------------------------------------------
# Plain-JAX glue: schedule and per-step scalar coefficients
# ---------------------------------------------------------------------------
def karras_schedule(num_steps, sigma_min=0.01, sigma_max=10.0, rho=7.0):
    rho_inv = 1.0 / rho
    steps = jnp.arange(num_steps, dtype=jnp.float32)
    sigmas = (sigma_max ** rho_inv
              + (steps / (num_steps - 1)) * (sigma_min ** rho_inv - sigma_max ** rho_inv)
              ) ** rho
    return jnp.concatenate([sigmas, jnp.zeros((1,), jnp.float32)])   # (num_steps + 1,)


def make_step_coeffs(sigmas, num_steps, sigma_data=0.5):
    sig = sigmas[: num_steps - 1]
    sig_next = sigmas[1:num_steps]
    sd2 = sigma_data * sigma_data
    denom = sig * sig + sd2
    c_skip = sd2 / denom
    c_out = sig * sigma_data / jnp.sqrt(denom)
    c_in = 1.0 / jnp.sqrt(denom)
    c_noise = jnp.log(sig) * 0.25
    sigma_up = jnp.sqrt(sig_next ** 2 * (sig ** 2 - sig_next ** 2) / (sig ** 2))
    sigma_down = jnp.sqrt(sig_next ** 2 - sigma_up ** 2)
    step_coef = (sigma_down - sig) / sig
    sigma0 = jnp.full_like(sig, sigmas[0])
    # columns: [c_skip, c_out, c_in, c_noise, step_coef, sigma_up, sigma0]
    return jnp.stack([c_skip, c_out, c_in, c_noise, step_coef, sigma_up, sigma0], axis=1)


# ---------------------------------------------------------------------------
# Wrapper around pallas_call
# ---------------------------------------------------------------------------
def diffusion_sample(noise, step_noise, coeffs, params):
    w1, b1, emb, w2, b2 = params
    B, C, T = noise.shape
    H = w1.shape[0]
    n_iters = step_noise.shape[0]
    BT = B * T

    # Layout plumbing (free): fold batch into the lane axis -> (C, B*T) slabs.
    noise_cl = jnp.transpose(noise, (1, 0, 2)).reshape(C, BT)
    eps_cl = jnp.transpose(step_noise, (0, 2, 1, 3)).reshape(n_iters, C, BT)

    grid_spec = pltpu.PrefetchScalarGridSpec(
        num_scalar_prefetch=1,
        grid=(1,),                                   # single invocation: loop is in-kernel
        in_specs=[
            pl.BlockSpec((C, BT), lambda i, c: (0, 0)),             # noise
            pl.BlockSpec((n_iters, C, BT), lambda i, c: (0, 0, 0)),  # all step-noise, resident
            pl.BlockSpec((H, C), lambda i, c: (0, 0)),               # w1
            pl.BlockSpec((H, 1), lambda i, c: (0, 0)),               # b1
            pl.BlockSpec((H, 1), lambda i, c: (0, 0)),               # sigma emb
            pl.BlockSpec((C, H), lambda i, c: (0, 0)),               # w2
            pl.BlockSpec((C, 1), lambda i, c: (0, 0)),               # b2
        ],
        out_specs=pl.BlockSpec((C, BT), lambda i, c: (0, 0)),
    )

    out_cl = pl.pallas_call(
        sampler_kernel,
        out_shape=jax.ShapeDtypeStruct((C, BT), jnp.float32),
        grid_spec=grid_spec,
        compiler_params=pltpu.CompilerParams(dimension_semantics=("arbitrary",)),
    )(coeffs, noise_cl, eps_cl, w1, b1, emb, w2, b2)

    # Back to PyTorch (B, C, T) audio layout.
    return jnp.transpose(out_cl.reshape(C, B, T), (1, 0, 2))


# ---------------------------------------------------------------------------
# Pure-JAX reference (mirrors the kernel semantics)
# ---------------------------------------------------------------------------
def reference_sample(noise, step_noise, coeffs, params):
    w1, b1, emb, w2, b2 = params
    x = coeffs[0, 6] * noise
    n_iters = step_noise.shape[0]
    for i in range(n_iters):
        c_skip, c_out, c_in, c_noise, step_coef, sigma_up = (coeffs[i, k] for k in range(6))
        h = jnp.einsum('hc,bct->bht', w1, c_in * x,
                       precision=jax.lax.Precision.HIGHEST)
        h = h + b1[None] + c_noise * emb[None]
        h = jax.nn.gelu(h)
        net_out = jnp.einsum('ch,bht->bct', w2, h,
                             precision=jax.lax.Precision.HIGHEST) + b2[None]
        x_denoised = c_skip * x + c_out * net_out
        x = x + (x - x_denoised) * step_coef + step_noise[i] * sigma_up
    return jnp.clip(x, -1.0, 1.0)


# ---------------------------------------------------------------------------
if __name__ == "__main__":
    B, C, T, H = 2, 4, 128, 32
    num_steps = 8

    key = jax.random.PRNGKey(0)
    k_noise, k_eps, k_w1, k_b1, k_emb, k_w2, k_b2 = jax.random.split(key, 7)

    noise = jax.random.normal(k_noise, (B, C, T), jnp.float32)
    step_noise = jax.random.normal(k_eps, (num_steps - 1, B, C, T), jnp.float32)

    # Deterministic synthetic denoiser-net parameters.
    w1 = jax.random.normal(k_w1, (H, C), jnp.float32) * (1.0 / jnp.sqrt(C))
    b1 = jax.random.normal(k_b1, (H, 1), jnp.float32) * 0.1
    emb = jax.random.normal(k_emb, (H, 1), jnp.float32) * 0.1
    w2 = jax.random.normal(k_w2, (C, H), jnp.float32) * (1.0 / jnp.sqrt(H))
    b2 = jax.random.normal(k_b2, (C, 1), jnp.float32) * 0.1
    params = (w1, b1, emb, w2, b2)

    sigmas = karras_schedule(num_steps)                 # sigma_schedule(num_steps)
    coeffs = make_step_coeffs(sigmas, num_steps)        # per-step scalars (glue)

    out = diffusion_sample(noise, step_noise, coeffs, params)
    out = jax.block_until_ready(out)

    ref = reference_sample(noise, step_noise, coeffs, params)
    assert out.shape == (B, C, T)
    assert jnp.allclose(out, ref, atol=5e-3, rtol=5e-3), \
        f"max abs err {jnp.max(jnp.abs(out - ref))}"

    print("KERNEL_OK")
</pallas_src>

<mosaic_0001>
module attributes {stable_mosaic.version = 11 : i64} {
  func.func @sampler_kernel(%arg0: i32, %arg1: memref<7x7xf32, #tpu.memory_space<smem>>, %arg2: memref<4x256xf32, #tpu.memory_space<vmem>>, %arg3: memref<7x4x256xf32, #tpu.memory_space<vmem>>, %arg4: memref<32x4xf32, #tpu.memory_space<vmem>>, %arg5: memref<32x1xf32, #tpu.memory_space<vmem>>, %arg6: memref<32x1xf32, #tpu.memory_space<vmem>>, %arg7: memref<4x32xf32, #tpu.memory_space<vmem>>, %arg8: memref<4x1xf32, #tpu.memory_space<vmem>>, %arg9: memref<4x256xf32, #tpu.memory_space<vmem>>) attributes {dimension_semantics = [#tpu.dimension_semantics<arbitrary>], iteration_bounds = array<i64: 1>, scalar_prefetch = 1 : i64, scratch_operands = 0 : i64, tpu.core_type = #tpu.core_type<tc>, window_params = [{pipeline_mode = #tpu.pipeline_mode<synchronous>, transform_indices = @transform_0, window_bounds = array<i64: 4, 256>}, {pipeline_mode = #tpu.pipeline_mode<synchronous>, transform_indices = @transform_1, window_bounds = array<i64: 7, 4, 256>}, {pipeline_mode = #tpu.pipeline_mode<synchronous>, transform_indices = @transform_2, window_bounds = array<i64: 32, 4>}, {pipeline_mode = #tpu.pipeline_mode<synchronous>, transform_indices = @transform_3, window_bounds = array<i64: 32, 1>}, {pipeline_mode = #tpu.pipeline_mode<synchronous>, transform_indices = @transform_4, window_bounds = array<i64: 32, 1>}, {pipeline_mode = #tpu.pipeline_mode<synchronous>, transform_indices = @transform_5, window_bounds = array<i64: 4, 32>}, {pipeline_mode = #tpu.pipeline_mode<synchronous>, transform_indices = @transform_6, window_bounds = array<i64: 4, 1>}, {pipeline_mode = #tpu.pipeline_mode<synchronous>, transform_indices = @transform_7, window_bounds = array<i64: 4, 256>}]} {
    %c0 = arith.constant 0 : index
    %c0_0 = arith.constant 0 : index
    %0 = vector.load %arg4[%c0, %c0_0] : memref<32x4xf32, #tpu.memory_space<vmem>>, vector<32x4xf32>
    %c0_1 = arith.constant 0 : index
    %c0_2 = arith.constant 0 : index
    %1 = vector.load %arg5[%c0_1, %c0_2] : memref<32x1xf32, #tpu.memory_space<vmem>>, vector<32x1xf32>
    %c0_3 = arith.constant 0 : index
    %c0_4 = arith.constant 0 : index
    %2 = vector.load %arg6[%c0_3, %c0_4] : memref<32x1xf32, #tpu.memory_space<vmem>>, vector<32x1xf32>
    %c0_5 = arith.constant 0 : index
    %c0_6 = arith.constant 0 : index
    %3 = vector.load %arg7[%c0_5, %c0_6] : memref<4x32xf32, #tpu.memory_space<vmem>>, vector<4x32xf32>
    %c0_7 = arith.constant 0 : index
    %c0_8 = arith.constant 0 : index
    %4 = vector.load %arg8[%c0_7, %c0_8] : memref<4x1xf32, #tpu.memory_space<vmem>>, vector<4x1xf32>
    %c0_9 = arith.constant 0 : index
    %c6 = arith.constant 6 : index
    %5 = memref.load %arg1[%c0_9, %c6] : memref<7x7xf32, #tpu.memory_space<smem>>
    %c0_10 = arith.constant 0 : index
    %c0_11 = arith.constant 0 : index
    %6 = vector.load %arg2[%c0_10, %c0_11] : memref<4x256xf32, #tpu.memory_space<vmem>>, vector<4x256xf32>
    %7 = vector.broadcast %5 : f32 to vector<4x256xf32>
    %8 = arith.mulf %7, %6 : vector<4x256xf32>
    %c0_i32 = arith.constant 0 : i32
    %9 = arith.index_cast %c0_i32 : i32 to index
    %c0_12 = arith.constant 0 : index
    %10 = memref.load %arg1[%9, %c0_12] : memref<7x7xf32, #tpu.memory_space<smem>>
    %11 = arith.index_cast %c0_i32 : i32 to index
    %c1 = arith.constant 1 : index
    %12 = memref.load %arg1[%11, %c1] : memref<7x7xf32, #tpu.memory_space<smem>>
    %13 = arith.index_cast %c0_i32 : i32 to index
    %c2 = arith.constant 2 : index
    %14 = memref.load %arg1[%13, %c2] : memref<7x7xf32, #tpu.memory_space<smem>>
    %15 = arith.index_cast %c0_i32 : i32 to index
    %c3 = arith.constant 3 : index
    %16 = memref.load %arg1[%15, %c3] : memref<7x7xf32, #tpu.memory_space<smem>>
    %17 = arith.index_cast %c0_i32 : i32 to index
    %c4 = arith.constant 4 : index
    %18 = memref.load %arg1[%17, %c4] : memref<7x7xf32, #tpu.memory_space<smem>>
    %19 = arith.index_cast %c0_i32 : i32 to index
    %c5 = arith.constant 5 : index
    %20 = memref.load %arg1[%19, %c5] : memref<7x7xf32, #tpu.memory_space<smem>>
    %21 = vector.broadcast %14 : f32 to vector<32x4xf32>
    %22 = arith.mulf %21, %0 : vector<32x4xf32>
    %23 = vector.broadcast %16 : f32 to vector<32x1xf32>
    %24 = arith.mulf %23, %2 : vector<32x1xf32>
    %25 = arith.addf %1, %24 : vector<32x1xf32>
    %26 = vector.broadcast %12 : f32 to vector<4x32xf32>
    %27 = arith.mulf %26, %3 : vector<4x32xf32>
    %28 = vector.broadcast %12 : f32 to vector<4x1xf32>
    %29 = arith.mulf %28, %4 : vector<4x1xf32>
    %cst = arith.constant dense<0.000000e+00> : vector<32x256xf32>
    %30 = tpu.matmul %22, %8, %cst {dimension_numbers = #tpu.dot_dimension_numbers<[1], [0], [0], [1], [0, 0, 1, 1], [], []>} : vector<32x4xf32>, vector<4x256xf32>, vector<32x256xf32> -> vector<32x256xf32>
    %31 = vector.broadcast %25 : vector<32x1xf32> to vector<32x256xf32>
    %32 = arith.addf %30, %31 : vector<32x256xf32>
    %33 = arith.mulf %32, %32 : vector<32x256xf32>
    %34 = arith.mulf %32, %33 : vector<32x256xf32>
    %cst_13 = arith.constant 4.471500e-02 : f32
    %35 = vector.broadcast %cst_13 : f32 to vector<32x256xf32>
    %36 = arith.mulf %35, %34 : vector<32x256xf32>
    %37 = arith.addf %32, %36 : vector<32x256xf32>
    %cst_14 = arith.constant 0.797884583 : f32
    %38 = vector.broadcast %cst_14 : f32 to vector<32x256xf32>
    %39 = arith.mulf %38, %37 : vector<32x256xf32>
    %40 = math.tanh %39 : vector<32x256xf32>
    %cst_15 = arith.constant 1.000000e+00 : f32
    %41 = vector.broadcast %cst_15 : f32 to vector<32x256xf32>
    %42 = arith.addf %41, %40 : vector<32x256xf32>
    %cst_16 = arith.constant 5.000000e-01 : f32
    %43 = vector.broadcast %cst_16 : f32 to vector<32x256xf32>
    %44 = arith.mulf %43, %42 : vector<32x256xf32>
    %45 = arith.mulf %32, %44 : vector<32x256xf32>
    %cst_17 = arith.constant dense<0.000000e+00> : vector<4x256xf32>
    %46 = tpu.matmul %27, %45, %cst_17 {dimension_numbers = #tpu.dot_dimension_numbers<[1], [0], [0], [1], [0, 0, 1, 1], [], []>} : vector<4x32xf32>, vector<32x256xf32>, vector<4x256xf32> -> vector<4x256xf32>
    %47 = vector.broadcast %29 : vector<4x1xf32> to vector<4x256xf32>
    %48 = arith.addf %46, %47 : vector<4x256xf32>
    %49 = vector.broadcast %10 : f32 to vector<4x256xf32>
    %50 = arith.mulf %49, %8 : vector<4x256xf32>
    %51 = arith.addf %50, %48 : vector<4x256xf32>
    %52 = arith.subf %8, %51 : vector<4x256xf32>
    %53 = vector.broadcast %18 : f32 to vector<4x256xf32>
    %54 = arith.mulf %52, %53 : vector<4x256xf32>
    %55 = arith.addf %8, %54 : vector<4x256xf32>
    %56 = arith.index_cast %c0_i32 : i32 to index
    %c0_18 = arith.constant 0 : index
    %c0_19 = arith.constant 0 : index
    %57 = vector.load %arg3[%56, %c0_18, %c0_19] : memref<7x4x256xf32, #tpu.memory_space<vmem>>, vector<1x4x256xf32>
    %58 = vector.shape_cast %57 : vector<1x4x256xf32> to vector<4x256xf32>
    %59 = vector.broadcast %20 : f32 to vector<4x256xf32>
    %60 = arith.mulf %58, %59 : vector<4x256xf32>
    %61 = arith.addf %55, %60 : vector<4x256xf32>
    %c1_i32 = arith.constant 1 : i32
    %62 = arith.index_cast %c1_i32 : i32 to index
    %c0_20 = arith.constant 0 : index
    %63 = memref.load %arg1[%62, %c0_20] : memref<7x7xf32, #tpu.memory_space<smem>>
    %64 = arith.index_cast %c1_i32 : i32 to index
    %c1_21 = arith.constant 1 : index
    %65 = memref.load %arg1[%64, %c1_21] : memref<7x7xf32, #tpu.memory_space<smem>>
    %66 = arith.index_cast %c1_i32 : i32 to index
    %c2_22 = arith.constant 2 : index
    %67 = memref.load %arg1[%66, %c2_22] : memref<7x7xf32, #tpu.memory_space<smem>>
    %68 = arith.index_cast %c1_i32 : i32 to index
    %c3_23 = arith.constant 3 : index
    %69 = memref.load %arg1[%68, %c3_23] : memref<7x7xf32, #tpu.memory_space<smem>>
    %70 = arith.index_cast %c1_i32 : i32 to index
    %c4_24 = arith.constant 4 : index
    %71 = memref.load %arg1[%70, %c4_24] : memref<7x7xf32, #tpu.memory_space<smem>>
    %72 = arith.index_cast %c1_i32 : i32 to index
    %c5_25 = arith.constant 5 : index
    %73 = memref.load %arg1[%72, %c5_25] : memref<7x7xf32, #tpu.memory_space<smem>>
    %74 = vector.broadcast %67 : f32 to vector<32x4xf32>
    %75 = arith.mulf %74, %0 : vector<32x4xf32>
    %76 = vector.broadcast %69 : f32 to vector<32x1xf32>
    %77 = arith.mulf %76, %2 : vector<32x1xf32>
    %78 = arith.addf %1, %77 : vector<32x1xf32>
    %79 = vector.broadcast %65 : f32 to vector<4x32xf32>
    %80 = arith.mulf %79, %3 : vector<4x32xf32>
    %81 = vector.broadcast %65 : f32 to vector<4x1xf32>
    %82 = arith.mulf %81, %4 : vector<4x1xf32>
    %cst_26 = arith.constant dense<0.000000e+00> : vector<32x256xf32>
    %83 = tpu.matmul %75, %61, %cst_26 {dimension_numbers = #tpu.dot_dimension_numbers<[1], [0], [0], [1], [0, 0, 1, 1], [], []>} : vector<32x4xf32>, vector<4x256xf32>, vector<32x256xf32> -> vector<32x256xf32>
    %84 = vector.broadcast %78 : vector<32x1xf32> to vector<32x256xf32>
    %85 = arith.addf %83, %84 : vector<32x256xf32>
    %86 = arith.mulf %85, %85 : vector<32x256xf32>
    %87 = arith.mulf %85, %86 : vector<32x256xf32>
    %cst_27 = arith.constant 4.471500e-02 : f32
    %88 = vector.broadcast %cst_27 : f32 to vector<32x256xf32>
    %89 = arith.mulf %88, %87 : vector<32x256xf32>
    %90 = arith.addf %85, %89 : vector<32x256xf32>
    %cst_28 = arith.constant 0.797884583 : f32
    %91 = vector.broadcast %cst_28 : f32 to vector<32x256xf32>
    %92 = arith.mulf %91, %90 : vector<32x256xf32>
    %93 = math.tanh %92 : vector<32x256xf32>
    %cst_29 = arith.constant 1.000000e+00 : f32
    %94 = vector.broadcast %cst_29 : f32 to vector<32x256xf32>
    %95 = arith.addf %94, %93 : vector<32x256xf32>
    %cst_30 = arith.constant 5.000000e-01 : f32
    %96 = vector.broadcast %cst_30 : f32 to vector<32x256xf32>
    %97 = arith.mulf %96, %95 : vector<32x256xf32>
    %98 = arith.mulf %85, %97 : vector<32x256xf32>
    %cst_31 = arith.constant dense<0.000000e+00> : vector<4x256xf32>
    %99 = tpu.matmul %80, %98, %cst_31 {dimension_numbers = #tpu.dot_dimension_numbers<[1], [0], [0], [1], [0, 0, 1, 1], [], []>} : vector<4x32xf32>, vector<32x256xf32>, vector<4x256xf32> -> vector<4x256xf32>
    %100 = vector.broadcast %82 : vector<4x1xf32> to vector<4x256xf32>
    %101 = arith.addf %99, %100 : vector<4x256xf32>
    %102 = vector.broadcast %63 : f32 to vector<4x256xf32>
    %103 = arith.mulf %102, %61 : vector<4x256xf32>
    %104 = arith.addf %103, %101 : vector<4x256xf32>
    %105 = arith.subf %61, %104 : vector<4x256xf32>
    %106 = vector.broadcast %71 : f32 to vector<4x256xf32>
    %107 = arith.mulf %105, %106 : vector<4x256xf32>
    %108 = arith.addf %61, %107 : vector<4x256xf32>
    %109 = arith.index_cast %c1_i32 : i32 to index
    %c0_32 = arith.constant 0 : index
    %c0_33 = arith.constant 0 : index
    %110 = vector.load %arg3[%109, %c0_32, %c0_33] : memref<7x4x256xf32, #tpu.memory_space<vmem>>, vector<1x4x256xf32>
    %111 = vector.shape_cast %110 : vector<1x4x256xf32> to vector<4x256xf32>
    %112 = vector.broadcast %73 : f32 to vector<4x256xf32>
    %113 = arith.mulf %111, %112 : vector<4x256xf32>
    %114 = arith.addf %108, %113 : vector<4x256xf32>
    %c2_i32 = arith.constant 2 : i32
    %115 = arith.index_cast %c2_i32 : i32 to index
    %c0_34 = arith.constant 0 : index
    %116 = memref.load %arg1[%115, %c0_34] : memref<7x7xf32, #tpu.memory_space<smem>>
    %117 = arith.index_cast %c2_i32 : i32 to index
    %c1_35 = arith.constant 1 : index
    %118 = memref.load %arg1[%117, %c1_35] : memref<7x7xf32, #tpu.memory_space<smem>>
    %119 = arith.index_cast %c2_i32 : i32 to index
    %c2_36 = arith.constant 2 : index
    %120 = memref.load %arg1[%119, %c2_36] : memref<7x7xf32, #tpu.memory_space<smem>>
    %121 = arith.index_cast %c2_i32 : i32 to index
    %c3_37 = arith.constant 3 : index
    %122 = memref.load %arg1[%121, %c3_37] : memref<7x7xf32, #tpu.memory_space<smem>>
    %123 = arith.index_cast %c2_i32 : i32 to index
    %c4_38 = arith.constant 4 : index
    %124 = memref.load %arg1[%123, %c4_38] : memref<7x7xf32, #tpu.memory_space<smem>>
    %125 = arith.index_cast %c2_i32 : i32 to index
    %c5_39 = arith.constant 5 : index
    %126 = memref.load %arg1[%125, %c5_39] : memref<7x7xf32, #tpu.memory_space<smem>>
    %127 = vector.broadcast %120 : f32 to vector<32x4xf32>
    %128 = arith.mulf %127, %0 : vector<32x4xf32>
    %129 = vector.broadcast %122 : f32 to vector<32x1xf32>
    %130 = arith.mulf %129, %2 : vector<32x1xf32>
    %131 = arith.addf %1, %130 : vector<32x1xf32>
    %132 = vector.broadcast %118 : f32 to vector<4x32xf32>
    %133 = arith.mulf %132, %3 : vector<4x32xf32>
    %134 = vector.broadcast %118 : f32 to vector<4x1xf32>
    %135 = arith.mulf %134, %4 : vector<4x1xf32>
    %cst_40 = arith.constant dense<0.000000e+00> : vector<32x256xf32>
    %136 = tpu.matmul %128, %114, %cst_40 {dimension_numbers = #tpu.dot_dimension_numbers<[1], [0], [0], [1], [0, 0, 1, 1], [], []>} : vector<32x4xf32>, vector<4x256xf32>, vector<32x256xf32> -> vector<32x256xf32>
    %137 = vector.broadcast %131 : vector<32x1xf32> to vector<32x256xf32>
    %138 = arith.addf %136, %137 : vector<32x256xf32>
    %139 = arith.mulf %138, %138 : vector<32x256xf32>
    %140 = arith.mulf %138, %139 : vector<32x256xf32>
    %cst_41 = arith.constant 4.471500e-02 : f32
    %141 = vector.broadcast %cst_41 : f32 to vector<32x256xf32>
    %142 = arith.mulf %141, %140 : vector<32x256xf32>
    %143 = arith.addf %138, %142 : vector<32x256xf32>
    %cst_42 = arith.constant 0.797884583 : f32
    %144 = vector.broadcast %cst_42 : f32 to vector<32x256xf32>
    %145 = arith.mulf %144, %143 : vector<32x256xf32>
    %146 = math.tanh %145 : vector<32x256xf32>
    %cst_43 = arith.constant 1.000000e+00 : f32
    %147 = vector.broadcast %cst_43 : f32 to vector<32x256xf32>
    %148 = arith.addf %147, %146 : vector<32x256xf32>
    %cst_44 = arith.constant 5.000000e-01 : f32
    %149 = vector.broadcast %cst_44 : f32 to vector<32x256xf32>
    %150 = arith.mulf %149, %148 : vector<32x256xf32>
    %151 = arith.mulf %138, %150 : vector<32x256xf32>
    %cst_45 = arith.constant dense<0.000000e+00> : vector<4x256xf32>
    %152 = tpu.matmul %133, %151, %cst_45 {dimension_numbers = #tpu.dot_dimension_numbers<[1], [0], [0], [1], [0, 0, 1, 1], [], []>} : vector<4x32xf32>, vector<32x256xf32>, vector<4x256xf32> -> vector<4x256xf32>
    %153 = vector.broadcast %135 : vector<4x1xf32> to vector<4x256xf32>
    %154 = arith.addf %152, %153 : vector<4x256xf32>
    %155 = vector.broadcast %116 : f32 to vector<4x256xf32>
    %156 = arith.mulf %155, %114 : vector<4x256xf32>
    %157 = arith.addf %156, %154 : vector<4x256xf32>
    %158 = arith.subf %114, %157 : vector<4x256xf32>
    %159 = vector.broadcast %124 : f32 to vector<4x256xf32>
    %160 = arith.mulf %158, %159 : vector<4x256xf32>
    %161 = arith.addf %114, %160 : vector<4x256xf32>
    %162 = arith.index_cast %c2_i32 : i32 to index
    %c0_46 = arith.constant 0 : index
    %c0_47 = arith.constant 0 : index
    %163 = vector.load %arg3[%162, %c0_46, %c0_47] : memref<7x4x256xf32, #tpu.memory_space<vmem>>, vector<1x4x256xf32>
    %164 = vector.shape_cast %163 : vector<1x4x256xf32> to vector<4x256xf32>
    %165 = vector.broadcast %126 : f32 to vector<4x256xf32>
    %166 = arith.mulf %164, %165 : vector<4x256xf32>
    %167 = arith.addf %161, %166 : vector<4x256xf32>
    %c3_i32 = arith.constant 3 : i32
    %168 = arith.index_cast %c3_i32 : i32 to index
    %c0_48 = arith.constant 0 : index
    %169 = memref.load %arg1[%168, %c0_48] : memref<7x7xf32, #tpu.memory_space<smem>>
    %170 = arith.index_cast %c3_i32 : i32 to index
    %c1_49 = arith.constant 1 : index
    %171 = memref.load %arg1[%170, %c1_49] : memref<7x7xf32, #tpu.memory_space<smem>>
    %172 = arith.index_cast %c3_i32 : i32 to index
    %c2_50 = arith.constant 2 : index
    %173 = memref.load %arg1[%172, %c2_50] : memref<7x7xf32, #tpu.memory_space<smem>>
    %174 = arith.index_cast %c3_i32 : i32 to index
    %c3_51 = arith.constant 3 : index
    %175 = memref.load %arg1[%174, %c3_51] : memref<7x7xf32, #tpu.memory_space<smem>>
    %176 = arith.index_cast %c3_i32 : i32 to index
    %c4_52 = arith.constant 4 : index
    %177 = memref.load %arg1[%176, %c4_52] : memref<7x7xf32, #tpu.memory_space<smem>>
    %178 = arith.index_cast %c3_i32 : i32 to index
    %c5_53 = arith.constant 5 : index
    %179 = memref.load %arg1[%178, %c5_53] : memref<7x7xf32, #tpu.memory_space<smem>>
    %180 = vector.broadcast %173 : f32 to vector<32x4xf32>
    %181 = arith.mulf %180, %0 : vector<32x4xf32>
    %182 = vector.broadcast %175 : f32 to vector<32x1xf32>
    %183 = arith.mulf %182, %2 : vector<32x1xf32>
    %184 = arith.addf %1, %183 : vector<32x1xf32>
    %185 = vector.broadcast %171 : f32 to vector<4x32xf32>
    %186 = arith.mulf %185, %3 : vector<4x32xf32>
    %187 = vector.broadcast %171 : f32 to vector<4x1xf32>
    %188 = arith.mulf %187, %4 : vector<4x1xf32>
    %cst_54 = arith.constant dense<0.000000e+00> : vector<32x256xf32>
    %189 = tpu.matmul %181, %167, %cst_54 {dimension_numbers = #tpu.dot_dimension_numbers<[1], [0], [0], [1], [0, 0, 1, 1], [], []>} : vector<32x4xf32>, vector<4x256xf32>, vector<32x256xf32> -> vector<32x256xf32>
    %190 = vector.broadcast %184 : vector<32x1xf32> to vector<32x256xf32>
    %191 = arith.addf %189, %190 : vector<32x256xf32>
    %192 = arith.mulf %191, %191 : vector<32x256xf32>
    %193 = arith.mulf %191, %192 : vector<32x256xf32>
    %cst_55 = arith.constant 4.471500e-02 : f32
    %194 = vector.broadcast %cst_55 : f32 to vector<32x256xf32>
    %195 = arith.mulf %194, %193 : vector<32x256xf32>
    %196 = arith.addf %191, %195 : vector<32x256xf32>
    %cst_56 = arith.constant 0.797884583 : f32
    %197 = vector.broadcast %cst_56 : f32 to vector<32x256xf32>
    %198 = arith.mulf %197, %196 : vector<32x256xf32>
    %199 = math.tanh %198 : vector<32x256xf32>
    %cst_57 = arith.constant 1.000000e+00 : f32
    %200 = vector.broadcast %cst_57 : f32 to vector<32x256xf32>
    %201 = arith.addf %200, %199 : vector<32x256xf32>
    %cst_58 = arith.constant 5.000000e-01 : f32
    %202 = vector.broadcast %cst_58 : f32 to vector<32x256xf32>
    %203 = arith.mulf %202, %201 : vector<32x256xf32>
    %204 = arith.mulf %191, %203 : vector<32x256xf32>
    %cst_59 = arith.constant dense<0.000000e+00> : vector<4x256xf32>
    %205 = tpu.matmul %186, %204, %cst_59 {dimension_numbers = #tpu.dot_dimension_numbers<[1], [0], [0], [1], [0, 0, 1, 1], [], []>} : vector<4x32xf32>, vector<32x256xf32>, vector<4x256xf32> -> vector<4x256xf32>
    %206 = vector.broadcast %188 : vector<4x1xf32> to vector<4x256xf32>
    %207 = arith.addf %205, %206 : vector<4x256xf32>
    %208 = vector.broadcast %169 : f32 to vector<4x256xf32>
    %209 = arith.mulf %208, %167 : vector<4x256xf32>
    %210 = arith.addf %209, %207 : vector<4x256xf32>
    %211 = arith.subf %167, %210 : vector<4x256xf32>
    %212 = vector.broadcast %177 : f32 to vector<4x256xf32>
    %213 = arith.mulf %211, %212 : vector<4x256xf32>
    %214 = arith.addf %167, %213 : vector<4x256xf32>
    %215 = arith.index_cast %c3_i32 : i32 to index
    %c0_60 = arith.constant 0 : index
    %c0_61 = arith.constant 0 : index
    %216 = vector.load %arg3[%215, %c0_60, %c0_61] : memref<7x4x256xf32, #tpu.memory_space<vmem>>, vector<1x4x256xf32>
    %217 = vector.shape_cast %216 : vector<1x4x256xf32> to vector<4x256xf32>
    %218 = vector.broadcast %179 : f32 to vector<4x256xf32>
    %219 = arith.mulf %217, %218 : vector<4x256xf32>
    %220 = arith.addf %214, %219 : vector<4x256xf32>
    %c4_i32 = arith.constant 4 : i32
    %221 = arith.index_cast %c4_i32 : i32 to index
    %c0_62 = arith.constant 0 : index
    %222 = memref.load %arg1[%221, %c0_62] : memref<7x7xf32, #tpu.memory_space<smem>>
    %223 = arith.index_cast %c4_i32 : i32 to index
    %c1_63 = arith.constant 1 : index
    %224 = memref.load %arg1[%223, %c1_63] : memref<7x7xf32, #tpu.memory_space<smem>>
    %225 = arith.index_cast %c4_i32 : i32 to index
    %c2_64 = arith.constant 2 : index
    %226 = memref.load %arg1[%225, %c2_64] : memref<7x7xf32, #tpu.memory_space<smem>>
    %227 = arith.index_cast %c4_i32 : i32 to index
    %c3_65 = arith.constant 3 : index
    %228 = memref.load %arg1[%227, %c3_65] : memref<7x7xf32, #tpu.memory_space<smem>>
    %229 = arith.index_cast %c4_i32 : i32 to index
    %c4_66 = arith.constant 4 : index
    %230 = memref.load %arg1[%229, %c4_66] : memref<7x7xf32, #tpu.memory_space<smem>>
    %231 = arith.index_cast %c4_i32 : i32 to index
    %c5_67 = arith.constant 5 : index
    %232 = memref.load %arg1[%231, %c5_67] : memref<7x7xf32, #tpu.memory_space<smem>>
    %233 = vector.broadcast %226 : f32 to vector<32x4xf32>
    %234 = arith.mulf %233, %0 : vector<32x4xf32>
    %235 = vector.broadcast %228 : f32 to vector<32x1xf32>
    %236 = arith.mulf %235, %2 : vector<32x1xf32>
    %237 = arith.addf %1, %236 : vector<32x1xf32>
    %238 = vector.broadcast %224 : f32 to vector<4x32xf32>
    %239 = arith.mulf %238, %3 : vector<4x32xf32>
    %240 = vector.broadcast %224 : f32 to vector<4x1xf32>
    %241 = arith.mulf %240, %4 : vector<4x1xf32>
    %cst_68 = arith.constant dense<0.000000e+00> : vector<32x256xf32>
    %242 = tpu.matmul %234, %220, %cst_68 {dimension_numbers = #tpu.dot_dimension_numbers<[1], [0], [0], [1], [0, 0, 1, 1], [], []>} : vector<32x4xf32>, vector<4x256xf32>, vector<32x256xf32> -> vector<32x256xf32>
    %243 = vector.broadcast %237 : vector<32x1xf32> to vector<32x256xf32>
    %244 = arith.addf %242, %243 : vector<32x256xf32>
    %245 = arith.mulf %244, %244 : vector<32x256xf32>
    %246 = arith.mulf %244, %245 : vector<32x256xf32>
    %cst_69 = arith.constant 4.471500e-02 : f32
    %247 = vector.broadcast %cst_69 : f32 to vector<32x256xf32>
    %248 = arith.mulf %247, %246 : vector<32x256xf32>
    %249 = arith.addf %244, %248 : vector<32x256xf32>
    %cst_70 = arith.constant 0.797884583 : f32
    %250 = vector.broadcast %cst_70 : f32 to vector<32x256xf32>
    %251 = arith.mulf %250, %249 : vector<32x256xf32>
    %252 = math.tanh %251 : vector<32x256xf32>
    %cst_71 = arith.constant 1.000000e+00 : f32
    %253 = vector.broadcast %cst_71 : f32 to vector<32x256xf32>
    %254 = arith.addf %253, %252 : vector<32x256xf32>
    %cst_72 = arith.constant 5.000000e-01 : f32
    %255 = vector.broadcast %cst_72 : f32 to vector<32x256xf32>
    %256 = arith.mulf %255, %254 : vector<32x256xf32>
    %257 = arith.mulf %244, %256 : vector<32x256xf32>
    %cst_73 = arith.constant dense<0.000000e+00> : vector<4x256xf32>
    %258 = tpu.matmul %239, %257, %cst_73 {dimension_numbers = #tpu.dot_dimension_numbers<[1], [0], [0], [1], [0, 0, 1, 1], [], []>} : vector<4x32xf32>, vector<32x256xf32>, vector<4x256xf32> -> vector<4x256xf32>
    %259 = vector.broadcast %241 : vector<4x1xf32> to vector<4x256xf32>
    %260 = arith.addf %258, %259 : vector<4x256xf32>
    %261 = vector.broadcast %222 : f32 to vector<4x256xf32>
    %262 = arith.mulf %261, %220 : vector<4x256xf32>
    %263 = arith.addf %262, %260 : vector<4x256xf32>
    %264 = arith.subf %220, %263 : vector<4x256xf32>
    %265 = vector.broadcast %230 : f32 to vector<4x256xf32>
    %266 = arith.mulf %264, %265 : vector<4x256xf32>
    %267 = arith.addf %220, %266 : vector<4x256xf32>
    %268 = arith.index_cast %c4_i32 : i32 to index
    %c0_74 = arith.constant 0 : index
    %c0_75 = arith.constant 0 : index
    %269 = vector.load %arg3[%268, %c0_74, %c0_75] : memref<7x4x256xf32, #tpu.memory_space<vmem>>, vector<1x4x256xf32>
    %270 = vector.shape_cast %269 : vector<1x4x256xf32> to vector<4x256xf32>
    %271 = vector.broadcast %232 : f32 to vector<4x256xf32>
    %272 = arith.mulf %270, %271 : vector<4x256xf32>
    %273 = arith.addf %267, %272 : vector<4x256xf32>
    %c5_i32 = arith.constant 5 : i32
    %274 = arith.index_cast %c5_i32 : i32 to index
    %c0_76 = arith.constant 0 : index
    %275 = memref.load %arg1[%274, %c0_76] : memref<7x7xf32, #tpu.memory_space<smem>>
    %276 = arith.index_cast %c5_i32 : i32 to index
    %c1_77 = arith.constant 1 : index
    %277 = memref.load %arg1[%276, %c1_77] : memref<7x7xf32, #tpu.memory_space<smem>>
    %278 = arith.index_cast %c5_i32 : i32 to index
    %c2_78 = arith.constant 2 : index
    %279 = memref.load %arg1[%278, %c2_78] : memref<7x7xf32, #tpu.memory_space<smem>>
    %280 = arith.index_cast %c5_i32 : i32 to index
    %c3_79 = arith.constant 3 : index
    %281 = memref.load %arg1[%280, %c3_79] : memref<7x7xf32, #tpu.memory_space<smem>>
    %282 = arith.index_cast %c5_i32 : i32 to index
    %c4_80 = arith.constant 4 : index
    %283 = memref.load %arg1[%282, %c4_80] : memref<7x7xf32, #tpu.memory_space<smem>>
    %284 = arith.index_cast %c5_i32 : i32 to index
    %c5_81 = arith.constant 5 : index
    %285 = memref.load %arg1[%284, %c5_81] : memref<7x7xf32, #tpu.memory_space<smem>>
    %286 = vector.broadcast %279 : f32 to vector<32x4xf32>
    %287 = arith.mulf %286, %0 : vector<32x4xf32>
    %288 = vector.broadcast %281 : f32 to vector<32x1xf32>
    %289 = arith.mulf %288, %2 : vector<32x1xf32>
    %290 = arith.addf %1, %289 : vector<32x1xf32>
    %291 = vector.broadcast %277 : f32 to vector<4x32xf32>
    %292 = arith.mulf %291, %3 : vector<4x32xf32>
    %293 = vector.broadcast %277 : f32 to vector<4x1xf32>
    %294 = arith.mulf %293, %4 : vector<4x1xf32>
    %cst_82 = arith.constant dense<0.000000e+00> : vector<32x256xf32>
    %295 = tpu.matmul %287, %273, %cst_82 {dimension_numbers = #tpu.dot_dimension_numbers<[1], [0], [0], [1], [0, 0, 1, 1], [], []>} : vector<32x4xf32>, vector<4x256xf32>, vector<32x256xf32> -> vector<32x256xf32>
    %296 = vector.broadcast %290 : vector<32x1xf32> to vector<32x256xf32>
    %297 = arith.addf %295, %296 : vector<32x256xf32>
    %298 = arith.mulf %297, %297 : vector<32x256xf32>
    %299 = arith.mulf %297, %298 : vector<32x256xf32>
    %cst_83 = arith.constant 4.471500e-02 : f32
    %300 = vector.broadcast %cst_83 : f32 to vector<32x256xf32>
    %301 = arith.mulf %300, %299 : vector<32x256xf32>
    %302 = arith.addf %297, %301 : vector<32x256xf32>
    %cst_84 = arith.constant 0.797884583 : f32
    %303 = vector.broadcast %cst_84 : f32 to vector<32x256xf32>
    %304 = arith.mulf %303, %302 : vector<32x256xf32>
    %305 = math.tanh %304 : vector<32x256xf32>
    %cst_85 = arith.constant 1.000000e+00 : f32
    %306 = vector.broadcast %cst_85 : f32 to vector<32x256xf32>
    %307 = arith.addf %306, %305 : vector<32x256xf32>
    %cst_86 = arith.constant 5.000000e-01 : f32
    %308 = vector.broadcast %cst_86 : f32 to vector<32x256xf32>
    %309 = arith.mulf %308, %307 : vector<32x256xf32>
    %310 = arith.mulf %297, %309 : vector<32x256xf32>
    %cst_87 = arith.constant dense<0.000000e+00> : vector<4x256xf32>
    %311 = tpu.matmul %292, %310, %cst_87 {dimension_numbers = #tpu.dot_dimension_numbers<[1], [0], [0], [1], [0, 0, 1, 1], [], []>} : vector<4x32xf32>, vector<32x256xf32>, vector<4x256xf32> -> vector<4x256xf32>
    %312 = vector.broadcast %294 : vector<4x1xf32> to vector<4x256xf32>
    %313 = arith.addf %311, %312 : vector<4x256xf32>
    %314 = vector.broadcast %275 : f32 to vector<4x256xf32>
    %315 = arith.mulf %314, %273 : vector<4x256xf32>
    %316 = arith.addf %315, %313 : vector<4x256xf32>
    %317 = arith.subf %273, %316 : vector<4x256xf32>
    %318 = vector.broadcast %283 : f32 to vector<4x256xf32>
    %319 = arith.mulf %317, %318 : vector<4x256xf32>
    %320 = arith.addf %273, %319 : vector<4x256xf32>
    %321 = arith.index_cast %c5_i32 : i32 to index
    %c0_88 = arith.constant 0 : index
    %c0_89 = arith.constant 0 : index
    %322 = vector.load %arg3[%321, %c0_88, %c0_89] : memref<7x4x256xf32, #tpu.memory_space<vmem>>, vector<1x4x256xf32>
    %323 = vector.shape_cast %322 : vector<1x4x256xf32> to vector<4x256xf32>
    %324 = vector.broadcast %285 : f32 to vector<4x256xf32>
    %325 = arith.mulf %323, %324 : vector<4x256xf32>
    %326 = arith.addf %320, %325 : vector<4x256xf32>
    %c6_i32 = arith.constant 6 : i32
    %327 = arith.index_cast %c6_i32 : i32 to index
    %c0_90 = arith.constant 0 : index
    %328 = memref.load %arg1[%327, %c0_90] : memref<7x7xf32, #tpu.memory_space<smem>>
    %329 = arith.index_cast %c6_i32 : i32 to index
    %c1_91 = arith.constant 1 : index
    %330 = memref.load %arg1[%329, %c1_91] : memref<7x7xf32, #tpu.memory_space<smem>>
    %331 = arith.index_cast %c6_i32 : i32 to index
    %c2_92 = arith.constant 2 : index
    %332 = memref.load %arg1[%331, %c2_92] : memref<7x7xf32, #tpu.memory_space<smem>>
    %333 = arith.index_cast %c6_i32 : i32 to index
    %c3_93 = arith.constant 3 : index
    %334 = memref.load %arg1[%333, %c3_93] : memref<7x7xf32, #tpu.memory_space<smem>>
    %335 = arith.index_cast %c6_i32 : i32 to index
    %c4_94 = arith.constant 4 : index
    %336 = memref.load %arg1[%335, %c4_94] : memref<7x7xf32, #tpu.memory_space<smem>>
    %337 = arith.index_cast %c6_i32 : i32 to index
    %c5_95 = arith.constant 5 : index
    %338 = memref.load %arg1[%337, %c5_95] : memref<7x7xf32, #tpu.memory_space<smem>>
    %339 = vector.broadcast %332 : f32 to vector<32x4xf32>
    %340 = arith.mulf %339, %0 : vector<32x4xf32>
    %341 = vector.broadcast %334 : f32 to vector<32x1xf32>
    %342 = arith.mulf %341, %2 : vector<32x1xf32>
    %343 = arith.addf %1, %342 : vector<32x1xf32>
    %344 = vector.broadcast %330 : f32 to vector<4x32xf32>
    %345 = arith.mulf %344, %3 : vector<4x32xf32>
    %346 = vector.broadcast %330 : f32 to vector<4x1xf32>
    %347 = arith.mulf %346, %4 : vector<4x1xf32>
    %cst_96 = arith.constant dense<0.000000e+00> : vector<32x256xf32>
    %348 = tpu.matmul %340, %326, %cst_96 {dimension_numbers = #tpu.dot_dimension_numbers<[1], [0], [0], [1], [0, 0, 1, 1], [], []>} : vector<32x4xf32>, vector<4x256xf32>, vector<32x256xf32> -> vector<32x256xf32>
    %349 = vector.broadcast %343 : vector<32x1xf32> to vector<32x256xf32>
    %350 = arith.addf %348, %349 : vector<32x256xf32>
    %351 = arith.mulf %350, %350 : vector<32x256xf32>
    %352 = arith.mulf %350, %351 : vector<32x256xf32>
    %cst_97 = arith.constant 4.471500e-02 : f32
    %353 = vector.broadcast %cst_97 : f32 to vector<32x256xf32>
    %354 = arith.mulf %353, %352 : vector<32x256xf32>
    %355 = arith.addf %350, %354 : vector<32x256xf32>
    %cst_98 = arith.constant 0.797884583 : f32
    %356 = vector.broadcast %cst_98 : f32 to vector<32x256xf32>
    %357 = arith.mulf %356, %355 : vector<32x256xf32>
    %358 = math.tanh %357 : vector<32x256xf32>
    %cst_99 = arith.constant 1.000000e+00 : f32
    %359 = vector.broadcast %cst_99 : f32 to vector<32x256xf32>
    %360 = arith.addf %359, %358 : vector<32x256xf32>
    %cst_100 = arith.constant 5.000000e-01 : f32
    %361 = vector.broadcast %cst_100 : f32 to vector<32x256xf32>
    %362 = arith.mulf %361, %360 : vector<32x256xf32>
    %363 = arith.mulf %350, %362 : vector<32x256xf32>
    %cst_101 = arith.constant dense<0.000000e+00> : vector<4x256xf32>
    %364 = tpu.matmul %345, %363, %cst_101 {dimension_numbers = #tpu.dot_dimension_numbers<[1], [0], [0], [1], [0, 0, 1, 1], [], []>} : vector<4x32xf32>, vector<32x256xf32>, vector<4x256xf32> -> vector<4x256xf32>
    %365 = vector.broadcast %347 : vector<4x1xf32> to vector<4x256xf32>
    %366 = arith.addf %364, %365 : vector<4x256xf32>
    %367 = vector.broadcast %328 : f32 to vector<4x256xf32>
    %368 = arith.mulf %367, %326 : vector<4x256xf32>
    %369 = arith.addf %368, %366 : vector<4x256xf32>
    %370 = arith.subf %326, %369 : vector<4x256xf32>
    %371 = vector.broadcast %336 : f32 to vector<4x256xf32>
    %372 = arith.mulf %370, %371 : vector<4x256xf32>
    %373 = arith.addf %326, %372 : vector<4x256xf32>
    %374 = arith.index_cast %c6_i32 : i32 to index
    %c0_102 = arith.constant 0 : index
    %c0_103 = arith.constant 0 : index
    %375 = vector.load %arg3[%374, %c0_102, %c0_103] : memref<7x4x256xf32, #tpu.memory_space<vmem>>, vector<1x4x256xf32>
    %376 = vector.shape_cast %375 : vector<1x4x256xf32> to vector<4x256xf32>
    %377 = vector.broadcast %338 : f32 to vector<4x256xf32>
    %378 = arith.mulf %376, %377 : vector<4x256xf32>
    %379 = arith.addf %373, %378 : vector<4x256xf32>
    %c7_i32 = arith.constant 7 : i32
    %cst_104 = arith.constant -1.000000e+00 : f32
    %cst_105 = arith.constant 1.000000e+00 : f32
    %380 = vector.broadcast %cst_104 : f32 to vector<4x256xf32>
    %381 = arith.maximumf %380, %379 : vector<4x256xf32>
    %382 = vector.broadcast %cst_105 : f32 to vector<4x256xf32>
    %383 = arith.minimumf %382, %381 : vector<4x256xf32>
    %c0_106 = arith.constant 0 : index
    %c0_107 = arith.constant 0 : index
    %384 = vector.load %arg9[%c0_106, %c0_107] : memref<4x256xf32, #tpu.memory_space<vmem>>, vector<4x256xf32>
    tpu.vector_store %arg9[%c0_106, %c0_107], %383 {strides = array<i32>} : memref<4x256xf32, #tpu.memory_space<vmem>>, vector<4x256xf32>,
    return
  }
  func.func @transform_0(%arg0: i32, %arg1: memref<7x7xf32, #tpu.memory_space<smem>>) -> (i32, i32) {
    %c0_i32 = arith.constant 0 : i32
    %c0_i32_0 = arith.constant 0 : i32
    %c0_i32_1 = arith.constant 0 : i32
    return %c0_i32, %c0_i32_0 : i32, i32
  }
  func.func @transform_1(%arg0: i32, %arg1: memref<7x7xf32, #tpu.memory_space<smem>>) -> (i32, i32, i32) {
    %c0_i32 = arith.constant 0 : i32
    %c0_i32_0 = arith.constant 0 : i32
    %c0_i32_1 = arith.constant 0 : i32
    %c0_i32_2 = arith.constant 0 : i32
    return %c0_i32, %c0_i32_0, %c0_i32_1 : i32, i32, i32
  }
  func.func @transform_2(%arg0: i32, %arg1: memref<7x7xf32, #tpu.memory_space<smem>>) -> (i32, i32) {
    %c0_i32 = arith.constant 0 : i32
    %c0_i32_0 = arith.constant 0 : i32
    %c0_i32_1 = arith.constant 0 : i32
    return %c0_i32, %c0_i32_0 : i32, i32
  }
  func.func @transform_3(%arg0: i32, %arg1: memref<7x7xf32, #tpu.memory_space<smem>>) -> (i32, i32) {
    %c0_i32 = arith.constant 0 : i32
    %c0_i32_0 = arith.constant 0 : i32
    %c0_i32_1 = arith.constant 0 : i32
    return %c0_i32, %c0_i32_0 : i32, i32
  }
  func.func @transform_4(%arg0: i32, %arg1: memref<7x7xf32, #tpu.memory_space<smem>>) -> (i32, i32) {
    %c0_i32 = arith.constant 0 : i32
    %c0_i32_0 = arith.constant 0 : i32
    %c0_i32_1 = arith.constant 0 : i32
    return %c0_i32, %c0_i32_0 : i32, i32
  }
  func.func @transform_5(%arg0: i32, %arg1: memref<7x7xf32, #tpu.memory_space<smem>>) -> (i32, i32) {
    %c0_i32 = arith.constant 0 : i32
    %c0_i32_0 = arith.constant 0 : i32
    %c0_i32_1 = arith.constant 0 : i32
    return %c0_i32, %c0_i32_0 : i32, i32
  }
  func.func @transform_6(%arg0: i32, %arg1: memref<7x7xf32, #tpu.memory_space<smem>>) -> (i32, i32) {
    %c0_i32 = arith.constant 0 : i32
    %c0_i32_0 = arith.constant 0 : i32
    %c0_i32_1 = arith.constant 0 : i32
    return %c0_i32, %c0_i32_0 : i32, i32
  }
  func.func @transform_7(%arg0: i32, %arg1: memref<7x7xf32, #tpu.memory_space<smem>>) -> (i32, i32) {
    %c0_i32 = arith.constant 0 : i32
    %c0_i32_0 = arith.constant 0 : i32
    %c0_i32_1 = arith.constant 0 : i32
    return %c0_i32, %c0_i32_0 : i32, i32
  }
}

</mosaic_0001>

<bundles_post_ra>
// kernel: tpu_custom_call.1
= control target key start
LH: loop header
LB: loop body
LE: loop exit
PB: predicated region body
PF: predicated region fallthrough
CT: control target
= control target key end

     0   :  { %s3326_s0 = inlined_call_operand.vmem [shape: f32[7,7], index: 0, kind: input, shape index: {}]   ;;  %s3327_s1 = inlined_call_operand.vmem [shape: f32[4,256], index: 1, kind: input, shape index: {}]   ;;  %s3328_s2 = inlined_call_operand.vmem [shape: f32[7,4,256], index: 2, kind: input, shape index: {}]   ;;  %s3329_s3 = inlined_call_operand.vmem [shape: f32[32,4], index: 3, kind: input, shape index: {}]   ;;  %s3330_s4 = inlined_call_operand.vmem [shape: f32[32,1], index: 4, kind: input, shape index: {}]   ;;  %s3331_s5 = inlined_call_operand.vmem [shape: f32[32,1], index: 5, kind: input, shape index: {}]   ;;  %s3332_s6 = inlined_call_operand.vmem [shape: f32[4,32], index: 6, kind: input, shape index: {}]   ;;  %s3333_s7 = inlined_call_operand.vmem [shape: f32[4,1], index: 7, kind: input, shape index: {}]   ;;  %s3334_s8 = inlined_call_operand.hbm [shape: f32[4,256], index: 8, kind: output, shape index: {}]  }
   0x1   :  { %s13_s29 = sshll.u32 %s3326_s0, 4  ;;  %s14_s29 = int_to_ptr.vmem [resolvable:$true] %s13_s29 }
   0x2   :  { %s2512_s30 = scalar_lea.vmem %s14_s29, 128  ;;  %p2517_p1 = scmp.lt.s32.totalorder %s14_s29, %s14_s29 }
   0x3   :  { %p2513_p0 = scmp.ne.s32.totalorder %s14_s29, %s2512_s30  ;;  %p2518_p2 = scmp.lt.s32.totalorder %s2512_s30, %s2512_s30 }
   0x5   :  { %p2519_p3 = por %p2518_p2, %p2517_p1 }
   0x7   :  { %p2520_p4 = pnand %p2519_p3, %p2513_p0 }
   0x9   :  { %2523 = shalt.err (!%p2520_p4)  }
   0xa   :  { %s2548_s9 = smov [#allocation3]  }
   0xb   :  { %16 = dma.vmem_to_smem %s14_s29, 128, %s2548_s9, [#allocation2] }
   0xc   :  { %2544 = dma.done.wait [#allocation2], 128 }
   0xd   :  { %2545 = vsyncadd [#allocation2], 4294967168 }
   0xe   :  { %18 = sfence }
   0xf   :  { %s2290_s10 = sld [smem:[#allocation3 + $0x6]]  ;;  %v2549_v0 = vmov 0.0   ;;  %v2550_v1 = vmov 0   ;;  %v49_v2 = vld [vmem:[%s3327_s1] sm:$0xff] }
  0x10   :  { %179 = vmatprep.mubr.f32.mxu0 %v2549_v0  ;;  %191 = vmatprep.mubr.f32.mxu1 %v2549_v0  ;;  %s2292_s0 = sld [smem:[#allocation3 + $0x2]] }
  0x11   :  { %2394 = vset.pattern.permute.xlu0 %v2550_v1  ;;  %s2293_s11 = sld [smem:[#allocation3 + $0x3]]  ;;  %2395 = vset.pattern.permute.xlu1 %v2550_v1 }
  0x12   :  { %s2605_s14 = sld [smem:[#allocation3 + $0x1]] }
  0x13   :  { %19 = vsyncpa [#allocation5], 0  ;;  %v2610_v4 = vld [vmem:[%s3329_s3] sm:$0xff]  ;;  %v2615_v5 = vld [vmem:[%s3329_s3 + $0x10] sm:$0xff]  ;;  %s2617_s19 = sld [smem:[#allocation3 + $0x83]]  ;;  %vm110_vm0 = vcmask 1043456  }
  0x14   :  { %v2624_v8 = vld [vmem:[%s3331_s5 + $0x18] sm:$0xff]  ;;  %s2626_s21 = sld [smem:[#allocation3 + $0x81]]  ;;  %v2631_v9 = vld [vmem:[%s3331_s5 + $0x10] sm:$0xff]  ;;  %v2636_v10 = vld [vmem:[%s3331_s5 + $0x8] sm:$0xff]  ;;  %vm97_vm1 = vcmask 31744   ;;  %vm281_vm2 = vcmask 261120  }
  0x15   :  { %v50_v3 = vstv %s2290_s10  ;;  %v2641_v11 = vld [vmem:[%s3331_s5] sm:$0xff]  ;;  %s2643_s28 = sld [smem:[#allocation3 + $0x101]]  ;;  %v2652_v15 = vld [vmem:[%s3330_s4 + $0x18] sm:$0xff]  ;;  %v2657_v17 = vld [vmem:[%s3329_s3 + $0x8] sm:$0xff]  ;;  %s2551_s23 = smov [#allocation4]  }
  0x16   :  { %v2619_v6 = vmul.f32 %v50_v3, %v49_v2  ;;  %v58_v7 = vstv %s2292_s0  ;;  %v2662_v18 = vld [vmem:[%s3329_s3 + $0x18] sm:$0xff]  ;;  %v2668_v20 = vld [vmem:[%s3330_s4 + $0x8] sm:$0xff]  ;;  %v2683_v25 = vld [vmem:[%s3330_s4 + $0x10] sm:$0xff]  ;;  %s2690_s18 = sld [smem:[#allocation3 + $0x181]] }
  0x17   :  { %v59_v13 = vmul.f32 %v58_v7, %v2610_v4  ;;  %v61_v14 = vmul.f32 %v58_v7, %v2615_v5  ;;  %v63_v16 = vstv %s2293_s11  ;;  %v2688_v26 = vld [vmem:[%s3330_s4] sm:$0xff]  ;;  %v60_v27 = vmul.f32 %v58_v7, %v2657_v17  ;;  %s2697_s1 = sld [smem:[#allocation3 + $0x201]] }
  0x18   :  { %v96_v12 = vcombine.high %v2619_v6, %v2619_v6  ;;  %v67_v19 = vmul.f32 %v63_v16, %v2624_v8  ;;  %v66_v21 = vmul.f32 %v63_v16, %v2631_v9  ;;  %v65_v22 = vmul.f32 %v63_v16, %v2636_v10  ;;  %v2707_v33 = vld [vmem:[%s3332_s6] sm:$0xf]  ;;  %s2376_s6 = sld [smem:[#allocation3 + $0x303]] }
  0x19   :  { %v64_v23 = vmul.f32 %v63_v16, %v2641_v11  ;;  %v62_v28 = vmul.f32 %v58_v7, %v2662_v18  ;;  %v72_v30 = vstv %s2605_s14  ;;  %v382_v31 = vstv %s2617_s19  ;;  %v2712_v34 = vld [vmem:[%s3333_s7] sm:$0xf]  ;;  %s2320_s19 = sld [smem:[#allocation3 + $0x103]] }
  0x1a   :  { %2296 = vmatprep.subr.msk.mxu0 %vm110_vm0, %v96_v12  ;;  %2388 = vmatprep.subr.msk.mxu1 %vm110_vm0, %v96_v12  ;;  %v71_v24 = vadd.f32 %v67_v19, %v2652_v15  ;;  %v69_v29 = vadd.f32 %v65_v22, %v2668_v20  ;;  %v70_v32 = vadd.f32 %v66_v21, %v2683_v25  ;;  %v391_v37 = vstv %s2626_s21  ;;  %s2729_s7 = sld [smem:[#allocation3 + $0x281]] }
  0x1b   :  { %2297 = vmatpush1.msk.msra.mxu0 %vm110_vm0, %v2619_v6  ;;  %2389 = vmatpush1.msk.msra.mxu1 %vm110_vm0, %v2619_v6  ;;  %v68_v35 = vadd.f32 %v64_v23, %v2688_v26  ;;  %v386_v36 = vmul.f32 %v382_v31, %v2624_v8  ;;  %v2718_v38 = vmul.f32 %v391_v37, %v2707_v33  ;;  %v708_v39 = vstv %s2643_s28  ;;  %s2735_s21 = sld [smem:[#allocation3 + $0x301]] }
  0x1c   :  { %2298 = vmatmul.mubr.msk.f32.vlgmr.msra.gmra.mxu0 %vm97_vm1, %v59_v13  ;;  %2300 = vmatmul.mubr.msk.f32.vlgmr.msra.gmra.mxu1 %vm97_vm1, %v61_v14  ;;  %v2724_v40 = vmul.f32 %v708_v39, %v2707_v33  ;;  %v74_v41 = vmul.f32 %v72_v30, %v2712_v34  ;;  %v385_v42 = vmul.f32 %v382_v31, %v2631_v9  ;;  %v1025_v45 = vstv %s2690_s18  ;;  %s2334_s24 = sld [smem:[#allocation3 + $0x183]] }
  0x1d   :  { %185 = vmatprep.mubr.f32.mxu0 %v2549_v0  ;;  %197 = vmatprep.mubr.f32.mxu1 %v2549_v0  ;;  %v390_v43 = vadd.f32 %v386_v36, %v2652_v15  ;;  %v384_v44 = vmul.f32 %v382_v31, %v2636_v10  ;;  %v1342_v46 = vstv %s2697_s1  ;;  %v383_v47 = vmul.f32 %v382_v31, %v2641_v11  ;;  %s2348_s25 = sld [smem:[#allocation3 + $0x203]] }
  0x1e   :  { %92 = vperm.xlu0 %2394, %v71_v24   ;;  %82 = vperm.xlu1 %2395, %v69_v29   ;;  %v2742_v48 = vmul.f32 %v1025_v45, %v2707_v33  ;;  %v2747_v49 = vmul.f32 %v1342_v46, %v2707_v33  ;;  %v389_v50 = vadd.f32 %v385_v42, %v2683_v25  ;;  %v2754_v56 = vstv %s2376_s6  ;;  %s2362_s26 = sld [smem:[#allocation3 + $0x283]] }
  0x1f   :  { %v699_v51 = vstv %s2320_s19  ;;  %v388_v52 = vadd.f32 %v384_v44, %v2668_v20  ;;  %v387_v53 = vadd.f32 %v383_v47, %v2688_v26  ;;  %v393_v55 = vmul.f32 %v391_v37, %v2712_v34  ;;  %s52_s27 = sld [smem:[#allocation3]]  ;;  %s2282_s19 = sshll.u32 %s2551_s23, 4  ;;  %s2283_s19 = int_to_ptr.vmem [resolvable:$true] %s2282_s19 }
  0x20   :  { %2299 = vmatmul.mubr.msk.f32.gmra.mxu0 %vm97_vm1, %v60_v27  ;;  %2301 = vmatmul.mubr.msk.f32.gmra.mxu1 %vm97_vm1, %v62_v28  ;;  %v703_v54 = vmul.f32 %v699_v51, %v2624_v8  ;;  %v702_v57 = vmul.f32 %v699_v51, %v2631_v9  ;;  %v1969_v58 = vmul.f32 %v2754_v56, %v2636_v10  ;;  %v1659_v59 = vstv %s2729_s7  ;;  %s2294_s28 = sld [smem:[#allocation3 + $0x4]]  ;;  %s2524_s6 = scalar_lea.vmem %s2283_s19, 128 }
  0x21   :  { %349 = vmatprep.mubr.f32.mxu1 %v2549_v0  ;;  %665 = vmatprep.mubr.f32.mxu0 %v2549_v0  ;;  %v1976_v60 = vstv %s2735_s21  ;;  %v2764_v61 = vmul.f32 %v1659_v59, %v2707_v33  ;;  %v701_v1 = vmul.f32 %v699_v51, %v2636_v10  ;;  %v700_v7 = vmul.f32 %v699_v51, %v2641_v11  ;;  %s2295_s29 = sld [smem:[#allocation3 + $0x5]]  ;;  %p2525_p5 = scmp.ne.s32.totalorder %s2283_s19, %s2524_s6 }
  0x22   :  { %87 = vperm.xlu0 %2394, %v70_v32   ;;  %77 = vperm.xlu1 %2395, %v68_v35   ;;  %v2769_v62 = vmul.f32 %v1976_v60, %v2707_v33  ;;  %v2772_v63 = vadd.f32 %v1969_v58, %v2668_v20  ;;  %v707_v2 = vadd.f32 %v703_v54, %v2652_v15  ;;  %v1016_v12 = vstv %s2334_s24  ;;  %s2305_s14 = sld [smem:[#allocation3 + $0x82]]  ;;  %p2529_p6 = scmp.lt.s32.totalorder %s2283_s19, %s2283_s19 }
  0x23   :  { %v706_v3 = vadd.f32 %v702_v57, %v2683_v25  ;;  %v705_v13 = vadd.f32 %v701_v1, %v2668_v20  ;;  %v704_v14 = vadd.f32 %v700_v7, %v2688_v26  ;;  %v1020_v16 = vmul.f32 %v1016_v12, %v2624_v8  ;;  %s2303_s10 = sld [smem:[#allocation3 + $0x80]]  ;;  %p2530_p7 = scmp.lt.s32.totalorder %s2524_s6, %s2524_s6 }
  0x24   :  { %v710_v19 = vmul.f32 %v708_v39, %v2712_v34  ;;  %v1019_v21 = vmul.f32 %v1016_v12, %v2631_v9  ;;  %v1018_v23 = vmul.f32 %v1016_v12, %v2636_v10  ;;  %v1017_v27 = vmul.f32 %v1016_v12, %v2641_v11  ;;  %s2307_s5 = sld [smem:[#allocation3 + $0x84]] }
  0x25   :  { %v1024_v22 = vadd.f32 %v1020_v16, %v2652_v15  ;;  %v1333_v28 = vstv %s2348_s25  ;;  %v1027_v35 = vmul.f32 %v1025_v45, %v2712_v34  ;;  %v1661_v1 = vmul.f32 %v1659_v59, %v2712_v34  ;;  %s2308_s0 = sld [smem:[#allocation3 + $0x85]]  ;;  %p2531_p8 = por %p2530_p7, %p2529_p6 }
  0x26   :  { %278 = vperm.xlu0 %2394, %v74_v41   ;;  %411 = vperm.xlu1 %2395, %v390_v43   ;;  %v1023_v24 = vadd.f32 %v1019_v21, %v2683_v25  ;;  %v1022_v29 = vadd.f32 %v1018_v23, %v2668_v20  ;;  %v1337_v31 = vmul.f32 %v1333_v28, %v2624_v8  ;;  %v1650_v43 = vstv %s2362_s26  ;;  %s2319_s12 = sld [smem:[#allocation3 + $0x102]] }
  0x27   :  { %v1021_v32 = vadd.f32 %v1017_v27, %v2688_v26  ;;  %v1336_v36 = vmul.f32 %v1333_v28, %v2631_v9  ;;  %v1335_v39 = vmul.f32 %v1333_v28, %v2636_v10  ;;  %v1334_v42 = vmul.f32 %v1333_v28, %v2641_v11  ;;  %s2317_s15 = sld [smem:[#allocation3 + $0x100]]  ;;  %p2532_p9 = pnand %p2531_p8, %p2525_p5 }
  0x28   :  { %v1341_v37 = vadd.f32 %v1337_v31, %v2652_v15  ;;  %v1654_v45 = vmul.f32 %v1650_v43, %v2624_v8  ;;  %v1653_v51 = vmul.f32 %v1650_v43, %v2631_v9  ;;  %v1651_v54 = vmul.f32 %v1650_v43, %v2641_v11  ;;  %s2321_s16 = sld [smem:[#allocation3 + $0x104]] }
  0x29   :  { %v1340_v41 = vadd.f32 %v1336_v36, %v2683_v25  ;;  %v1339_v44 = vadd.f32 %v1335_v39, %v2668_v20  ;;  %v1338_v47 = vadd.f32 %v1334_v42, %v2688_v26  ;;  %v1978_v59 = vmul.f32 %v1976_v60, %v2712_v34  ;;  %s2322_s17 = sld [smem:[#allocation3 + $0x105]] }
  0x2a   :  { %406 = vperm.xlu0 %2394, %v389_v50   ;;  %401 = vperm.xlu1 %2395, %v388_v52   ;;  %v1344_v50 = vmul.f32 %v1342_v46, %v2712_v34  ;;  %v1658_v52 = vadd.f32 %v1654_v45, %v2652_v15  ;;  %v1655_v58 = vadd.f32 %v1651_v54, %v2688_v26  ;;  %s2333_s18 = sld [smem:[#allocation3 + $0x182]] }
  0x2b   :  { %v1971_v46 = vmul.f32 %v2754_v56, %v2624_v8  ;;  %s2335_s25 = sld [smem:[#allocation3 + $0x184]] }
  0x2c   :  { %s2336_s26 = sld [smem:[#allocation3 + $0x185]] }
  0x2d   :  { %s2349_s30 = sld [smem:[#allocation3 + $0x204]] }
  0x2e   :  { %396 = vperm.xlu0 %2394, %v387_v53   ;;  %595 = vperm.xlu1 %2395, %v393_v55   ;;  %v1652_v53 = vmul.f32 %v1650_v43, %v2636_v10  ;;  %v1657_v55 = vadd.f32 %v1653_v51, %v2683_v25  ;;  %v1970_v10 = vmul.f32 %v2754_v56, %v2631_v9  ;;  %s2350_s9 = sld [smem:[#allocation3 + $0x205]] }
  0x2f   :  { %s2363_s13 = sld [smem:[#allocation3 + $0x284]] }
  0x30   :  { %v1656_v57 = vadd.f32 %v1652_v53, %v2668_v20  ;;  %v1974_v20 = vadd.f32 %v1970_v10, %v2683_v25  ;;  %s2364_s11 = sld [smem:[#allocation3 + $0x285]] }
  0x31   :  { %s2377_s1 = sld [smem:[#allocation3 + $0x304]] }
  0x32   :  { %728 = vperm.xlu0 %2394, %v707_v2   ;;  %723 = vperm.xlu1 %2395, %v706_v3   ;;  %v1975_v2 = vadd.f32 %v1971_v46, %v2652_v15  ;;  %v1968_v3 = vmul.f32 %v2754_v56, %v2641_v11  ;;  %s2378_s4 = sld [smem:[#allocation3 + $0x305]] }
  0x34   :  { %v1972_v8 = vadd.f32 %v1968_v3, %v2688_v26 }
  0x36   :  { %718 = vperm.xlu0 %2394, %v705_v13   ;;  %713 = vperm.xlu1 %2395, %v704_v14  }
  0x3a   :  { %912 = vperm.xlu0 %2394, %v710_v19   ;;  %1045 = vperm.xlu1 %2395, %v1024_v22  }
  0x3e   :  { %1040 = vperm.xlu0 %2394, %v1023_v24   ;;  %1035 = vperm.xlu1 %2395, %v1022_v29  }
  0x42   :  { %1030 = vperm.xlu0 %2394, %v1021_v32   ;;  %1229 = vperm.xlu1 %2395, %v1027_v35  }
  0x46   :  { %1362 = vperm.xlu0 %2394, %v1341_v37   ;;  %1357 = vperm.xlu1 %2395, %v1340_v41  }
  0x4a   :  { %1352 = vperm.xlu0 %2394, %v1339_v44   ;;  %1347 = vperm.xlu1 %2395, %v1338_v47  }
  0x4e   :  { %1546 = vperm.xlu0 %2394, %v1344_v50   ;;  %1679 = vperm.xlu1 %2395, %v1658_v52  }
  0x52   :  { %1674 = vperm.xlu0 %2394, %v1657_v55   ;;  %1669 = vperm.xlu1 %2395, %v1656_v57  }
  0x56   :  { %1664 = vperm.xlu0 %2394, %v1655_v58   ;;  %1863 = vperm.xlu1 %2395, %v1661_v1  }
  0x5a   :  { %1996 = vperm.xlu0 %2394, %v1975_v2   ;;  %1991 = vperm.xlu1 %2395, %v1974_v20  }
  0x5e   :  { %1986 = vperm.xlu0 %2394, %v2772_v63   ;;  %1981 = vperm.xlu1 %2395, %v1972_v8  }
  0x62   :  { %2180 = vperm.xlu0 %2394, %v1978_v59  }
  0x99   :  { %v93_v9 = vpop.permute.xlu0 %92  ;;  %v83_v7 = vpop.permute.xlu1 %82 }
  0x9d   :  { %v88_v15 = vpop.permute.xlu0 %87  ;;  %v78_v12 = vpop.permute.xlu1 %77 }
  0xdc   :  { %v181_v13 = vpop.f32.mrf.mxu0  ;;  %v193_v25 = vpop.f32.mrf.mxu1 }
  0xdd   :  { %v2825_v14 = vadd.f32 %v181_v13, %v78_v12  ;;  %v2827_v11 = vadd.f32 %v193_v25, %v88_v15 }
  0xde   :  { %v183_v56 = vpop.f32.mrf.mxu0  ;;  %v195_v16 = vpop.f32.mrf.mxu1 }
  0xdf   :  { %v204_v26 = vmul.f32 %v2825_v14, %v2825_v14  ;;  %v208_v34 = vmul.f32 %v2827_v11, %v2827_v11  ;;  %v2833_v60 = vadd.f32 %v183_v56, %v78_v12  ;;  %v2835_v63 = vadd.f32 %v195_v16, %v88_v15 }
  0xe0   :  { %v187_v19 = vpop.f32.mrf.mxu0  ;;  %v199_v21 = vpop.f32.mrf.mxu1 }
  0xe1   :  { %v212_v22 = vmul.f32 %v204_v26, %v2825_v14  ;;  %v216_v23 = vmul.f32 %v208_v34, %v2827_v11  ;;  %v205_v24 = vmul.f32 %v2833_v60, %v2833_v60  ;;  %v209_v27 = vmul.f32 %v2835_v63, %v2835_v63 }
  0xe2   :  { %v2843_v28 = vadd.f32 %v187_v19, %v83_v7  ;;  %v2845_v29 = vadd.f32 %v199_v21, %v93_v9  ;;  %v189_v31 = vpop.f32.mrf.mxu0  ;;  %v201_v32 = vpop.f32.mrf.mxu1 }
  0xe3   :  { %v224_v35 = vmul.f32 0.044715, %v216_v23  ;;  %v213_v36 = vmul.f32 %v205_v24, %v2833_v60  ;;  %v217_v37 = vmul.f32 %v209_v27, %v2835_v63  ;;  %v2853_v42 = vadd.f32 %v189_v31, %v83_v7 }
  0xe4   :  { %v206_v39 = vmul.f32 %v2843_v28, %v2843_v28  ;;  %v210_v41 = vmul.f32 %v2845_v29, %v2845_v29  ;;  %v202_v43 = vadd.f32 %v201_v32, %v93_v9  ;;  %v220_v44 = vmul.f32 0.044715, %v212_v22 }
  0xe5   :  { %v232_v47 = vadd.f32 %v224_v35, %v2827_v11  ;;  %v221_v45 = vmul.f32 0.044715, %v213_v36  ;;  %v225_v50 = vmul.f32 0.044715, %v217_v37  ;;  %v207_v53 = vmul.f32 %v2853_v42, %v2853_v42 }
  0xe6   :  { %v214_v51 = vmul.f32 %v206_v39, %v2843_v28  ;;  %v218_v52 = vmul.f32 %v210_v41, %v2845_v29  ;;  %v211_v54 = vmul.f32 %v202_v43, %v202_v43  ;;  %v228_v8 = vadd.f32 %v220_v44, %v2825_v14 }
  0xe7   :  { %v240_v55 = vmul.f32 0.7978846, %v232_v47  ;;  %v229_v57 = vadd.f32 %v221_v45, %v2833_v60  ;;  %v233_v58 = vadd.f32 %v225_v50, %v2835_v63  ;;  %v215_v10 = vmul.f32 %v207_v53, %v2853_v42 }
  0xe8   :  { %v222_v46 = vmul.f32 0.044715, %v214_v51  ;;  %v226_v1 = vmul.f32 0.044715, %v218_v52  ;;  %v219_v2 = vmul.f32 %v211_v54, %v202_v43  ;;  %v236_v16 = vmul.f32 0.7978846, %v228_v8 }
  0xe9   :  { %v237_v20 = vmul.f32 0.7978846, %v229_v57  ;;  %v241_v3 = vmul.f32 0.7978846, %v233_v58  ;;  %v223_v7 = vmul.f32 0.044715, %v215_v10  ;;  %2396 = vtanh.f32 %v240_v55 }
  0xea   :  { %v230_v59 = vadd.f32 %v222_v46, %v2843_v28  ;;  %v234_v9 = vadd.f32 %v226_v1, %v2845_v29  ;;  %v227_v15 = vmul.f32 0.044715, %v219_v2 }
  0xeb   :  { %2398 = vtanh.f32 %v237_v20  ;;  %v231_v25 = vadd.f32 %v223_v7, %v2853_v42  ;;  %v367_v7 = vld [vmem:[%s3328_s2] sm:$0xff] }
  0xec   :  { %v238_v12 = vmul.f32 0.7978846, %v230_v59  ;;  %v242_v13 = vmul.f32 0.7978846, %v234_v9  ;;  %2400 = vtanh.f32 %v241_v3  ;;  %v235_v56 = vadd.f32 %v227_v15, %v202_v43 }
  0xed   :  { %v239_v26 = vmul.f32 0.7978846, %v231_v25  ;;  %v364_v9 = vstv %s2294_s28  ;;  %v368_v15 = vstv %s2295_s29 }
  0xee   :  { %2402 = vtanh.f32 %v238_v12  ;;  %v243_v34 = vmul.f32 0.7978846, %v235_v56  ;;  %v369_v25 = vmul.f32 %v368_v15, %v367_v7 }
  0xef   :  { %2404 = vtanh.f32 %v242_v13 }
  0xf0   :  { %2406 = vtanh.f32 %v239_v26 }
  0xf1   :  { %2408 = vtanh.f32 %v243_v34 }
  0xf2   :  { %2410 = vtanh.f32 %v236_v16  ;;  %v377_v16 = vstv %s2305_s14  ;;  %s2345_s14 = sld [smem:[#allocation3 + $0x200]] }
  0xf6   :  { %v2397_v19 = vpop.eup %2396 }
  0xf7   :  { %v256_v36 = vadd.f32 1.0, %v2397_v19  ;;  %v378_v19 = vmul.f32 %v377_v16, %v2610_v4 }
  0xf8   :  { %v2399_v21 = vpop.eup %2398 }
  0xf9   :  { %v2401_v22 = vpop.eup %2400  ;;  %v253_v51 = vadd.f32 1.0, %v2399_v21  ;;  %v264_v52 = vmul.f32 0.5, %v256_v36  ;;  %v379_v21 = vmul.f32 %v377_v16, %v2657_v17 }
  0xfa   :  { %v257_v32 = vadd.f32 1.0, %v2401_v22  ;;  %v381_v22 = vmul.f32 %v377_v16, %v2662_v18 }
  0xfb   :  { %v2403_v23 = vpop.eup %2402  ;;  %v261_v1 = vmul.f32 0.5, %v253_v51  ;;  %v272_v10 = vmul.f32 %v264_v52, %v2827_v11 }
  0xfc   :  { %v2405_v24 = vpop.eup %2404  ;;  %v254_v47 = vadd.f32 1.0, %v2403_v23  ;;  %v265_v50 = vmul.f32 0.5, %v257_v32 }
  0xfd   :  { %v2407_v27 = vpop.eup %2406  ;;  %v258_v31 = vadd.f32 1.0, %v2405_v24  ;;  %v412_v24 = vpop.permute.xlu1 %411 }
  0xfe   :  { %v2409_v35 = vpop.eup %2408  ;;  %v255_v41 = vadd.f32 1.0, %v2407_v27  ;;  %v262_v58 = vmul.f32 0.5, %v254_v47  ;;  %v273_v46 = vmul.f32 %v265_v50, %v2835_v63 }
  0xff   :  { %v2411_v37 = vpop.eup %2410  ;;  %v259_v39 = vadd.f32 1.0, %v2409_v35  ;;  %v266_v44 = vmul.f32 0.5, %v258_v31 }
 0x100   :  { %v252_v53 = vadd.f32 1.0, %v2411_v37  ;;  %v263_v55 = vmul.f32 0.5, %v255_v41  ;;  %v270_v3 = vmul.f32 %v262_v58, %v2843_v28  ;;  %v356_v28 = vstv %s52_s27  ;;  %s2347_s27 = sld [smem:[#allocation3 + $0x202]] }
 0x101   :  { %v267_v45 = vmul.f32 0.5, %v259_v39  ;;  %v274_v57 = vmul.f32 %v266_v44, %v2845_v29  ;;  %v269_v29 = vmul.f32 %v261_v1, %v2833_v60  ;;  %v357_v60 = vmul.f32 %v356_v28, %v2619_v6  ;;  %v402_v36 = vpop.permute.xlu1 %401 }
 0x102   :  { %v260_v2 = vmul.f32 0.5, %v252_v53  ;;  %v271_v20 = vmul.f32 %v263_v55, %v2853_v42  ;;  %v279_v42 = vpop.permute.xlu0 %278 }
 0x103   :  { %v275_v54 = vmul.f32 %v267_v45, %v202_v43  ;;  %v73_v43 = vmul.f32 %v72_v30, %v2707_v33 }
 0x104   :  { %v268_v63 = vmul.f32 %v260_v2, %v2825_v14 }
 0x105   :  { %309 = vmatprep.subr.mxu1 %v275_v54 }
 0x106   :  { %310 = vmatpush1.msra.mxu1 %v274_v57  ;;  %v407_v23 = vpop.permute.xlu0 %406 }
 0x107   :  { %311 = vmatprep.subr.mxu1 %v273_v46 }
 0x108   :  { %312 = vmatpush1.msra.mxu1 %v272_v10 }
 0x109   :  { %313 = vmatprep.subr.mxu1 %v271_v20 }
 0x10a   :  { %314 = vmatpush1.msra.mxu1 %v270_v3  ;;  %v397_v31 = vpop.permute.xlu0 %396 }
 0x10b   :  { %315 = vmatprep.subr.mxu1 %v269_v29 }
 0x10c   :  { %316 = vmatpush1.msra.mxu1 %v268_v63 }
 0x10d   :  { %2302 = vmatmul.mubr.msk.f32.vlgmr.msra.gmra.mxu1 %vm281_vm2, %v73_v43 }
 0x10e   :  { %496 = vmatprep.mubr.f32.mxu1 %v2549_v0 }
 0x1cd   :  { %v351_v11 = vpop.f32.mrf.mxu1 }
 0x1ce   :  { %v352_v33 = vadd.f32 %v351_v11, %v279_v42 }
 0x1cf   :  { %v353_v30 = vpop.f32.mrf.mxu1 }
 0x1d0   :  { %v354_v8 = vadd.f32 %v353_v30, %v279_v42 }
 0x1d2   :  { %v360_v59 = vcombine.low %v352_v33, %v354_v8 }
 0x1d4   :  { %v362_v14 = vadd.f32 %v360_v59, %v357_v60 }
 0x1d6   :  { %v363_v12 = vsub.f32 %v2619_v6, %v362_v14 }
 0x1d8   :  { %v365_v13 = vmul.f32 %v364_v9, %v363_v12 }
 0x1da   :  { %v366_v56 = vadd.f32 %v365_v13, %v2619_v6  ;;  %v380_v6 = vmul.f32 %v377_v16, %v2615_v5 }
 0x1dc   :  { %v2885_v26 = vadd.f32 %v369_v25, %v366_v56 }
 0x1de   :  { %v415_v34 = vcombine.high %v2885_v26, %v2885_v26 }
 0x1e0   :  { %2309 = vmatprep.subr.msk.mxu1 %vm110_vm0, %v415_v34 }
 0x1e1   :  { %2310 = vmatpush1.msk.msra.mxu1 %vm110_vm0, %v2885_v26 }
 0x1e2   :  { %2311 = vmatmul.mubr.msk.f32.vlgmr.msra.gmra.mxu1 %vm97_vm1, %v378_v19 }
 0x1e3   :  { %502 = vmatprep.mubr.f32.mxu1 %v2549_v0 }
 0x1e6   :  { %2312 = vmatmul.mubr.msk.f32.gmra.mxu1 %vm97_vm1, %v379_v21 }
 0x1e7   :  { %508 = vmatprep.mubr.f32.mxu1 %v2549_v0 }
 0x1ea   :  { %2313 = vmatmul.mubr.msk.f32.gmra.mxu1 %vm97_vm1, %v380_v6 }
 0x1eb   :  { %514 = vmatprep.mubr.f32.mxu1 %v2549_v0 }
 0x1ee   :  { %2314 = vmatmul.mubr.msk.f32.gmra.mxu1 %vm97_vm1, %v381_v22 }
 0x1ef   :  { %982 = vmatprep.mubr.f32.mxu1 %v2549_v0 }
 0x2a2   :  { %v498_v27 = vpop.f32.mrf.mxu1 }
 0x2a3   :  { %v2906_v37 = vadd.f32 %v498_v27, %v397_v31 }
 0x2a4   :  { %v500_v32 = vpop.f32.mrf.mxu1 }
 0x2a5   :  { %v2904_v35 = vadd.f32 %v500_v32, %v397_v31  ;;  %v521_v52 = vmul.f32 %v2906_v37, %v2906_v37 }
 0x2a6   :  { %v504_v39 = vpop.f32.mrf.mxu1 }
 0x2a7   :  { %v522_v41 = vmul.f32 %v2904_v35, %v2904_v35  ;;  %v2910_v44 = vadd.f32 %v504_v39, %v402_v36  ;;  %v529_v2 = vmul.f32 %v521_v52, %v2906_v37 }
 0x2a8   :  { %v506_v47 = vpop.f32.mrf.mxu1 }
 0x2a9   :  { %v530_v45 = vmul.f32 %v522_v41, %v2904_v35  ;;  %v523_v50 = vmul.f32 %v2910_v44, %v2910_v44  ;;  %v2915_v51 = vadd.f32 %v506_v47, %v402_v36  ;;  %v537_v60 = vmul.f32 0.044715, %v529_v2 }
 0x2aa   :  { %v510_v53 = vpop.f32.mrf.mxu1 }
 0x2ab   :  { %v538_v54 = vmul.f32 0.044715, %v530_v45  ;;  %v531_v55 = vmul.f32 %v523_v50, %v2910_v44  ;;  %v524_v57 = vmul.f32 %v2915_v51, %v2915_v51  ;;  %v2922_v58 = vadd.f32 %v510_v53, %v407_v23 }
 0x2ac   :  { %v512_v46 = vpop.f32.mrf.mxu1  ;;  %v545_v19 = vadd.f32 %v537_v60, %v2906_v37 }
 0x2ad   :  { %v539_v1 = vmul.f32 0.044715, %v531_v55  ;;  %v532_v10 = vmul.f32 %v524_v57, %v2915_v51  ;;  %v525_v20 = vmul.f32 %v2922_v58, %v2922_v58  ;;  %v2928_v3 = vadd.f32 %v512_v46, %v407_v23 }
 0x2ae   :  { %v516_v43 = vpop.f32.mrf.mxu1  ;;  %v546_v29 = vadd.f32 %v538_v54, %v2904_v35  ;;  %v553_v36 = vmul.f32 0.7978846, %v545_v19 }
 0x2af   :  { %v540_v63 = vmul.f32 0.044715, %v532_v10  ;;  %v547_v11 = vadd.f32 %v539_v1, %v2910_v44  ;;  %v533_v28 = vmul.f32 %v525_v20, %v2922_v58  ;;  %v526_v42 = vmul.f32 %v2928_v3, %v2928_v3 }
 0x2b0   :  { %v517_v30 = vadd.f32 %v516_v43, %v412_v24  ;;  %v518_v33 = vpop.f32.mrf.mxu1  ;;  %v554_v7 = vmul.f32 0.7978846, %v546_v29 }
 0x2b1   :  { %v519_v8 = vadd.f32 %v518_v33, %v412_v24  ;;  %v541_v59 = vmul.f32 0.044715, %v533_v28  ;;  %v534_v14 = vmul.f32 %v526_v42, %v2928_v3  ;;  %v548_v15 = vadd.f32 %v540_v63, %v2915_v51 }
 0x2b2   :  { %v527_v9 = vmul.f32 %v517_v30, %v517_v30  ;;  %v555_v13 = vmul.f32 0.7978846, %v547_v11  ;;  %2412 = vtanh.f32 %v554_v7 }
 0x2b3   :  { %v528_v12 = vmul.f32 %v519_v8, %v519_v8  ;;  %v549_v25 = vadd.f32 %v541_v59, %v2922_v58  ;;  %v542_v56 = vmul.f32 0.044715, %v534_v14  ;;  %v556_v23 = vmul.f32 0.7978846, %v548_v15 }
 0x2b4   :  { %v535_v16 = vmul.f32 %v527_v9, %v517_v30  ;;  %2414 = vtanh.f32 %v555_v13 }
 0x2b5   :  { %v536_v34 = vmul.f32 %v528_v12, %v519_v8  ;;  %v557_v21 = vmul.f32 0.7978846, %v549_v25  ;;  %v550_v6 = vadd.f32 %v542_v56, %v2928_v3 }
 0x2b6   :  { %v543_v22 = vmul.f32 0.044715, %v535_v16 }
 0x2b7   :  { %v544_v24 = vmul.f32 0.044715, %v536_v34  ;;  %v558_v27 = vmul.f32 0.7978846, %v550_v6  ;;  %2416 = vtanh.f32 %v557_v21  ;;  %v680_v21 = vstv %s2307_s5 }
 0x2b8   :  { %v551_v31 = vadd.f32 %v543_v22, %v517_v30  ;;  %v685_v6 = vstv %s2308_s0 }
 0x2b9   :  { %v552_v32 = vadd.f32 %v544_v24, %v519_v8  ;;  %2418 = vtanh.f32 %v558_v27 }
 0x2ba   :  { %v559_v39 = vmul.f32 0.7978846, %v551_v31  ;;  %2420 = vtanh.f32 %v556_v23  ;;  %v694_v31 = vstv %s2319_s12  ;;  %s2359_s12 = sld [smem:[#allocation3 + $0x280]] }
 0x2bb   :  { %v560_v41 = vmul.f32 0.7978846, %v552_v32 }
 0x2bc   :  { %2422 = vtanh.f32 %v559_v39  ;;  %v695_v39 = vmul.f32 %v694_v31, %v2610_v4  ;;  %v698_v4 = vmul.f32 %v694_v31, %v2662_v18 }
 0x2bd   :  { %2424 = vtanh.f32 %v560_v41  ;;  %v696_v41 = vmul.f32 %v694_v31, %v2657_v17  ;;  %v729_v17 = vpop.permute.xlu0 %728 }
 0x2be   :  { %2426 = vtanh.f32 %v553_v36 }
 0x2bf   :  { %v2413_v47 = vpop.eup %2412 }
 0x2c0   :  { %v570_v28 = vadd.f32 1.0, %v2413_v47 }
 0x2c1   :  { %v2415_v45 = vpop.eup %2414 }
 0x2c2   :  { %v571_v29 = vadd.f32 1.0, %v2415_v45  ;;  %v578_v15 = vmul.f32 0.5, %v570_v28 }
 0x2c4   :  { %v2417_v50 = vpop.eup %2416  ;;  %v579_v9 = vmul.f32 0.5, %v571_v29 }
 0x2c5   :  { %v573_v1 = vadd.f32 1.0, %v2417_v50 }
 0x2c6   :  { %v2419_v52 = vpop.eup %2418  ;;  %v587_v56 = vmul.f32 %v579_v9, %v2910_v44  ;;  %v672_v44 = vstv %s2303_s10  ;;  %s2361_s10 = sld [smem:[#allocation3 + $0x282]] }
 0x2c7   :  { %v2421_v53 = vpop.eup %2420  ;;  %v574_v55 = vadd.f32 1.0, %v2419_v52  ;;  %v581_v42 = vmul.f32 0.5, %v573_v1 }
 0x2c8   :  { %v572_v20 = vadd.f32 1.0, %v2421_v53 }
 0x2c9   :  { %v2423_v54 = vpop.eup %2422  ;;  %v582_v11 = vmul.f32 0.5, %v574_v55  ;;  %v589_v12 = vmul.f32 %v581_v42, %v2922_v58 }
 0x2ca   :  { %v2425_v57 = vpop.eup %2424  ;;  %v575_v46 = vadd.f32 1.0, %v2423_v54  ;;  %v580_v59 = vmul.f32 0.5, %v572_v20 }
 0x2cb   :  { %v2427_v10 = vpop.eup %2426  ;;  %v576_v2 = vadd.f32 1.0, %v2425_v57  ;;  %v590_v7 = vmul.f32 %v582_v11, %v2928_v3 }
 0x2cc   :  { %v583_v43 = vmul.f32 0.5, %v575_v46  ;;  %v569_v33 = vadd.f32 1.0, %v2427_v10  ;;  %v588_v25 = vmul.f32 %v580_v59, %v2915_v51  ;;  %v596_v51 = vpop.permute.xlu1 %595 }
 0x2cd   :  { %v584_v63 = vmul.f32 0.5, %v576_v2 }
 0x2ce   :  { %v591_v14 = vmul.f32 %v583_v43, %v517_v30  ;;  %v577_v13 = vmul.f32 0.5, %v569_v33 }
 0x2cf   :  { %v592_v60 = vmul.f32 %v584_v63, %v519_v8  ;;  %v586_v8 = vmul.f32 %v578_v15, %v2904_v35  ;;  %v673_v35 = vmul.f32 %v672_v44, %v2885_v26 }
 0x2d0   :  { %v585_v30 = vmul.f32 %v577_v13, %v2906_v37  ;;  %v724_v47 = vpop.permute.xlu1 %723 }
 0x2d1   :  { %625 = vmatprep.subr.mxu0 %v592_v60 }
 0x2d2   :  { %626 = vmatpush1.msra.mxu0 %v591_v14 }
 0x2d3   :  { %627 = vmatprep.subr.mxu0 %v590_v7 }
 0x2d4   :  { %628 = vmatpush1.msra.mxu0 %v589_v12  ;;  %v714_v50 = vpop.permute.xlu1 %713 }
 0x2d5   :  { %629 = vmatprep.subr.mxu0 %v588_v25 }
 0x2d6   :  { %630 = vmatpush1.msra.mxu0 %v587_v56 }
 0x2d7   :  { %631 = vmatprep.subr.mxu0 %v586_v8 }
 0x2d8   :  { %632 = vmatpush1.msra.mxu0 %v585_v30 }
 0x2d9   :  { %2315 = vmatmul.mubr.msk.f32.vlgmr.msra.gmra.mxu0 %vm281_vm2, %v2718_v38  ;;  %v2316_v38 = vld [vmem:[%s3328_s2 + $0x8] sm:$0xff] }
 0x2da   :  { %813 = vmatprep.mubr.f32.mxu0 %v2549_v0  ;;  %v686_v24 = vmul.f32 %v2316_v38, %v685_v6 }
 0x399   :  { %v667_v58 = vpop.f32.mrf.mxu0 }
 0x39a   :  { %v668_v16 = vadd.f32 %v667_v58, %v596_v51 }
 0x39b   :  { %v669_v3 = vpop.f32.mrf.mxu0 }
 0x39c   :  { %v670_v34 = vadd.f32 %v669_v3, %v596_v51 }
 0x39e   :  { %v676_v19 = vcombine.low %v668_v16, %v670_v34 }
 0x3a0   :  { %v678_v37 = vadd.f32 %v676_v19, %v673_v35 }
 0x3a2   :  { %v679_v22 = vsub.f32 %v2885_v26, %v678_v37 }
 0x3a4   :  { %v681_v23 = vmul.f32 %v680_v21, %v679_v22 }
 0x3a6   :  { %v682_v27 = vadd.f32 %v681_v23, %v2885_v26  ;;  %v697_v26 = vmul.f32 %v694_v31, %v2615_v5  ;;  %v719_v5 = vpop.permute.xlu0 %718 }
 0x3a8   :  { %v2955_v32 = vadd.f32 %v686_v24, %v682_v27 }
 0x3aa   :  { %v732_v36 = vcombine.high %v2955_v32, %v2955_v32 }
 0x3ac   :  { %2323 = vmatprep.subr.msk.mxu0 %vm110_vm0, %v732_v36 }
 0x3ad   :  { %2324 = vmatpush1.msk.msra.mxu0 %vm110_vm0, %v2955_v32 }
 0x3ae   :  { %2325 = vmatmul.mubr.msk.f32.vlgmr.msra.gmra.mxu0 %vm97_vm1, %v695_v39 }
 0x3af   :  { %819 = vmatprep.mubr.f32.mxu0 %v2549_v0 }
 0x3b2   :  { %2326 = vmatmul.mubr.msk.f32.gmra.mxu0 %vm97_vm1, %v696_v41 }
 0x3b3   :  { %825 = vmatprep.mubr.f32.mxu0 %v2549_v0 }
 0x3b6   :  { %2327 = vmatmul.mubr.msk.f32.gmra.mxu0 %vm97_vm1, %v697_v26 }
 0x3b7   :  { %831 = vmatprep.mubr.f32.mxu0 %v2549_v0 }
 0x3ba   :  { %2328 = vmatmul.mubr.msk.f32.gmra.mxu0 %vm97_vm1, %v698_v4 }
 0x3bb   :  { %1299 = vmatprep.mubr.f32.mxu0 %v2549_v0 }
 0x46e   :  { %v815_v45 = vpop.f32.mrf.mxu0 }
 0x46f   :  { %v2976_v54 = vadd.f32 %v815_v45, %v714_v50 }
 0x470   :  { %v817_v52 = vpop.f32.mrf.mxu0 }
 0x471   :  { %v2974_v53 = vadd.f32 %v817_v52, %v714_v50  ;;  %v838_v20 = vmul.f32 %v2976_v54, %v2976_v54 }
 0x472   :  { %v821_v55 = vpop.f32.mrf.mxu0 }
 0x473   :  { %v839_v18 = vmul.f32 %v2974_v53, %v2974_v53  ;;  %v2980_v57 = vadd.f32 %v821_v55, %v719_v5  ;;  %v846_v59 = vmul.f32 %v838_v20, %v2976_v54 }
 0x474   :  { %v823_v46 = vpop.f32.mrf.mxu0 }
 0x475   :  { %v847_v1 = vmul.f32 %v839_v18, %v2974_v53  ;;  %v840_v10 = vmul.f32 %v2980_v57, %v2980_v57  ;;  %v2985_v2 = vadd.f32 %v823_v46, %v719_v5  ;;  %v854_v51 = vmul.f32 0.044715, %v846_v59 }
 0x476   :  { %v827_v43 = vpop.f32.mrf.mxu0 }
 0x477   :  { %v855_v29 = vmul.f32 0.044715, %v847_v1  ;;  %v848_v63 = vmul.f32 %v840_v10, %v2980_v57  ;;  %v841_v11 = vmul.f32 %v2985_v2, %v2985_v2  ;;  %v2992_v28 = vadd.f32 %v827_v43, %v724_v47 }
 0x478   :  { %v829_v42 = vpop.f32.mrf.mxu0  ;;  %v862_v23 = vadd.f32 %v854_v51, %v2976_v54 }
 0x479   :  { %v856_v33 = vmul.f32 0.044715, %v848_v63  ;;  %v849_v60 = vmul.f32 %v841_v11, %v2985_v2  ;;  %v842_v14 = vmul.f32 %v2992_v28, %v2992_v28  ;;  %v2998_v9 = vadd.f32 %v829_v42, %v724_v47 }
 0x47a   :  { %v833_v7 = vpop.f32.mrf.mxu0  ;;  %v863_v15 = vadd.f32 %v855_v29, %v2974_v53  ;;  %v870_v47 = vmul.f32 0.7978846, %v862_v23 }
 0x47b   :  { %v857_v12 = vmul.f32 0.044715, %v849_v60  ;;  %v864_v13 = vadd.f32 %v856_v33, %v2980_v57  ;;  %v850_v25 = vmul.f32 %v842_v14, %v2992_v28  ;;  %v843_v56 = vmul.f32 %v2998_v9, %v2998_v9 }
 0x47c   :  { %v834_v8 = vadd.f32 %v833_v7, %v729_v17  ;;  %v835_v30 = vpop.f32.mrf.mxu0  ;;  %v871_v34 = vmul.f32 0.7978846, %v863_v15 }
 0x47d   :  { %v836_v58 = vadd.f32 %v835_v30, %v729_v17  ;;  %v858_v3 = vmul.f32 0.044715, %v850_v25  ;;  %v851_v44 = vmul.f32 %v843_v56, %v2998_v9  ;;  %v865_v35 = vadd.f32 %v857_v12, %v2985_v2 }
 0x47e   :  { %v844_v16 = vmul.f32 %v834_v8, %v834_v8  ;;  %v872_v37 = vmul.f32 0.7978846, %v864_v13  ;;  %2428 = vtanh.f32 %v871_v34 }
 0x47f   :  { %v845_v19 = vmul.f32 %v836_v58, %v836_v58  ;;  %v866_v21 = vadd.f32 %v858_v3, %v2992_v28  ;;  %v859_v38 = vmul.f32 0.044715, %v851_v44  ;;  %v873_v36 = vmul.f32 0.7978846, %v865_v35 }
 0x480   :  { %v852_v6 = vmul.f32 %v844_v16, %v834_v8  ;;  %2430 = vtanh.f32 %v872_v37 }
 0x481   :  { %v853_v22 = vmul.f32 %v845_v19, %v836_v58  ;;  %v874_v24 = vmul.f32 0.7978846, %v866_v21  ;;  %v867_v27 = vadd.f32 %v859_v38, %v2998_v9  ;;  %v997_v21 = vstv %s2321_s16 }
 0x482   :  { %v860_v31 = vmul.f32 0.044715, %v852_v6  ;;  %v1002_v38 = vstv %s2322_s17 }
 0x483   :  { %v861_v39 = vmul.f32 0.044715, %v853_v22  ;;  %v875_v41 = vmul.f32 0.7978846, %v867_v27  ;;  %2432 = vtanh.f32 %v874_v24  ;;  %v1011_v27 = vstv %s2333_s18  ;;  %s2373_s18 = sld [smem:[#allocation3 + $0x300]] }
 0x484   :  { %v868_v26 = vadd.f32 %v860_v31, %v834_v8 }
 0x485   :  { %v869_v4 = vadd.f32 %v861_v39, %v836_v58  ;;  %2434 = vtanh.f32 %v875_v41  ;;  %v3032_v39 = vld [vmem:[%s3329_s3] sm:$0xff] }
 0x486   :  { %v876_v17 = vmul.f32 0.7978846, %v868_v26  ;;  %2436 = vtanh.f32 %v873_v36  ;;  %v1012_v41 = vmul.f32 %v3032_v39, %v1011_v27 }
 0x487   :  { %v877_v45 = vmul.f32 0.7978846, %v869_v4  ;;  %v3050_v4 = vld [vmem:[%s3329_s3 + $0x10] sm:$0xff] }
 0x488   :  { %2438 = vtanh.f32 %v876_v17  ;;  %v3058_v17 = vld [vmem:[%s3329_s3 + $0x18] sm:$0xff] }
 0x489   :  { %2440 = vtanh.f32 %v877_v45  ;;  %v1015_v45 = vmul.f32 %v3058_v17, %v1011_v27 }
 0x48a   :  { %2442 = vtanh.f32 %v870_v47  ;;  %v1014_v47 = vmul.f32 %v3050_v4, %v1011_v27 }
 0x48b   :  { %v2429_v50 = vpop.eup %2428 }
 0x48c   :  { %v887_v14 = vadd.f32 1.0, %v2429_v50 }
 0x48d   :  { %v2431_v52 = vpop.eup %2430 }
 0x48e   :  { %v888_v33 = vadd.f32 1.0, %v2431_v52  ;;  %v895_v51 = vmul.f32 0.5, %v887_v14  ;;  %v1046_v52 = vpop.permute.xlu1 %1045 }
 0x490   :  { %v2433_v5 = vpop.eup %2432  ;;  %v896_v56 = vmul.f32 0.5, %v888_v33 }
 0x491   :  { %v890_v43 = vadd.f32 1.0, %v2433_v5 }
 0x492   :  { %v2435_v55 = vpop.eup %2434  ;;  %v904_v34 = vmul.f32 %v896_v56, %v2980_v57  ;;  %v989_v57 = vstv %s2317_s15  ;;  %s2375_s15 = sld [smem:[#allocation3 + $0x302]] }
 0x493   :  { %v2437_v18 = vpop.eup %2436  ;;  %v891_v1 = vadd.f32 1.0, %v2435_v55  ;;  %v898_v7 = vmul.f32 0.5, %v890_v43 }
 0x494   :  { %v889_v11 = vadd.f32 1.0, %v2437_v18 }
 0x495   :  { %v2439_v46 = vpop.eup %2438  ;;  %v899_v59 = vmul.f32 0.5, %v891_v1  ;;  %v906_v3 = vmul.f32 %v898_v7, %v2992_v28  ;;  %v1036_v1 = vpop.permute.xlu1 %1035 }
 0x496   :  { %v2441_v10 = vpop.eup %2440  ;;  %v892_v20 = vadd.f32 1.0, %v2439_v46  ;;  %v897_v13 = vmul.f32 0.5, %v889_v11 }
 0x497   :  { %v2443_v29 = vpop.eup %2442  ;;  %v893_v63 = vadd.f32 1.0, %v2441_v10  ;;  %v907_v30 = vmul.f32 %v899_v59, %v2998_v9 }
 0x498   :  { %v900_v42 = vmul.f32 0.5, %v892_v20  ;;  %v886_v15 = vadd.f32 1.0, %v2443_v29  ;;  %v905_v16 = vmul.f32 %v897_v13, %v2985_v2  ;;  %v913_v2 = vpop.permute.xlu0 %912 }
 0x499   :  { %v901_v60 = vmul.f32 0.5, %v893_v63 }
 0x49a   :  { %v908_v25 = vmul.f32 %v900_v42, %v834_v8  ;;  %v894_v44 = vmul.f32 0.5, %v886_v15 }
 0x49b   :  { %v909_v12 = vmul.f32 %v901_v60, %v836_v58  ;;  %v903_v58 = vmul.f32 %v895_v51, %v2974_v53  ;;  %v990_v53 = vmul.f32 %v989_v57, %v2955_v32 }
 0x49c   :  { %v902_v8 = vmul.f32 %v894_v44, %v2976_v54  ;;  %v1041_v50 = vpop.permute.xlu0 %1040 }
 0x49d   :  { %942 = vmatprep.subr.mxu1 %v909_v12 }
 0x49e   :  { %943 = vmatpush1.msra.mxu1 %v908_v25 }
 0x49f   :  { %944 = vmatprep.subr.mxu1 %v907_v30 }
 0x4a0   :  { %945 = vmatpush1.msra.mxu1 %v906_v3  ;;  %v1031_v55 = vpop.permute.xlu0 %1030 }
 0x4a1   :  { %946 = vmatprep.subr.mxu1 %v905_v16 }
 0x4a2   :  { %947 = vmatpush1.msra.mxu1 %v904_v34 }
 0x4a3   :  { %948 = vmatprep.subr.mxu1 %v903_v58 }
 0x4a4   :  { %949 = vmatpush1.msra.mxu1 %v902_v8 }
 0x4a5   :  { %2329 = vmatmul.mubr.msk.f32.vlgmr.msra.gmra.mxu1 %vm281_vm2, %v2724_v40  ;;  %v2330_v40 = vld [vmem:[%s3328_s2 + $0x10] sm:$0xff] }
 0x4a6   :  { %1130 = vmatprep.mubr.f32.mxu1 %v2549_v0  ;;  %v1003_v23 = vmul.f32 %v2330_v40, %v1002_v38 }
 0x565   :  { %v984_v28 = vpop.f32.mrf.mxu1 }
 0x566   :  { %v985_v35 = vadd.f32 %v984_v28, %v913_v2 }
 0x567   :  { %v986_v9 = vpop.f32.mrf.mxu1 }
 0x568   :  { %v987_v19 = vadd.f32 %v986_v9, %v913_v2 }
 0x56a   :  { %v993_v37 = vcombine.low %v985_v35, %v987_v19 }
 0x56c   :  { %v995_v54 = vadd.f32 %v993_v37, %v990_v53 }
 0x56e   :  { %v996_v6 = vsub.f32 %v2955_v32, %v995_v54 }
 0x570   :  { %v998_v22 = vmul.f32 %v997_v21, %v996_v6 }
 0x572   :  { %v999_v24 = vadd.f32 %v998_v22, %v2955_v32  ;;  %v3042_v32 = vld [vmem:[%s3329_s3 + $0x8] sm:$0xff]  ;;  %s2331_s3 = sld [smem:[#allocation3 + $0x180]] }
 0x573   :  { %v1013_v26 = vmul.f32 %v3042_v32, %v1011_v27 }
 0x574   :  { %v3025_v31 = vadd.f32 %v1003_v23, %v999_v24 }
 0x576   :  { %v1049_v36 = vcombine.high %v3025_v31, %v3025_v31 }
 0x578   :  { %2337 = vmatprep.subr.msk.mxu1 %vm110_vm0, %v1049_v36 }
 0x579   :  { %2338 = vmatpush1.msk.msra.mxu1 %vm110_vm0, %v3025_v31 }
 0x57a   :  { %2339 = vmatmul.mubr.msk.f32.vlgmr.msra.gmra.mxu1 %vm97_vm1, %v1012_v41 }
 0x57b   :  { %1136 = vmatprep.mubr.f32.mxu1 %v2549_v0 }
 0x57e   :  { %2340 = vmatmul.mubr.msk.f32.gmra.mxu1 %vm97_vm1, %v1013_v26 }
 0x57f   :  { %1142 = vmatprep.mubr.f32.mxu1 %v2549_v0 }
 0x582   :  { %2341 = vmatmul.mubr.msk.f32.gmra.mxu1 %vm97_vm1, %v1014_v47 }
 0x583   :  { %1148 = vmatprep.mubr.f32.mxu1 %v2549_v0 }
 0x586   :  { %2342 = vmatmul.mubr.msk.f32.gmra.mxu1 %vm97_vm1, %v1015_v45 }
 0x587   :  { %1616 = vmatprep.mubr.f32.mxu1 %v2549_v0 }
 0x63a   :  { %v1132_v5 = vpop.f32.mrf.mxu1 }
 0x63b   :  { %v3066_v10 = vadd.f32 %v1132_v5, %v1031_v55 }
 0x63c   :  { %v1134_v18 = vpop.f32.mrf.mxu1 }
 0x63d   :  { %v3064_v46 = vadd.f32 %v1134_v18, %v1031_v55  ;;  %v1155_v60 = vmul.f32 %v3066_v10, %v3066_v10 }
 0x63e   :  { %v1138_v20 = vpop.f32.mrf.mxu1 }
 0x63f   :  { %v1156_v43 = vmul.f32 %v3064_v46, %v3064_v46  ;;  %v3070_v29 = vadd.f32 %v1138_v20, %v1036_v1  ;;  %v1163_v30 = vmul.f32 %v1155_v60, %v3066_v10 }
 0x640   :  { %v1140_v63 = vpop.f32.mrf.mxu1 }
 0x641   :  { %v1164_v11 = vmul.f32 %v1156_v43, %v3064_v46  ;;  %v1157_v42 = vmul.f32 %v3070_v29, %v3070_v29  ;;  %v3075_v33 = vadd.f32 %v1140_v63, %v1036_v1  ;;  %v1171_v35 = vmul.f32 0.044715, %v1163_v30 }
 0x642   :  { %v1144_v59 = vpop.f32.mrf.mxu1 }
 0x643   :  { %v1172_v14 = vmul.f32 0.044715, %v1164_v11  ;;  %v1165_v7 = vmul.f32 %v1157_v42, %v3070_v29  ;;  %v1158_v15 = vmul.f32 %v3075_v33, %v3075_v33  ;;  %v3082_v12 = vadd.f32 %v1144_v59, %v1041_v50 }
 0x644   :  { %v1146_v13 = vpop.f32.mrf.mxu1  ;;  %v1179_v27 = vadd.f32 %v1171_v35, %v3066_v10 }
 0x645   :  { %v1173_v25 = vmul.f32 0.044715, %v1165_v7  ;;  %v1166_v56 = vmul.f32 %v1158_v15, %v3075_v33  ;;  %v1159_v51 = vmul.f32 %v3082_v12, %v3082_v12  ;;  %v3088_v3 = vadd.f32 %v1146_v13, %v1041_v50 }
 0x646   :  { %v1150_v44 = vpop.f32.mrf.mxu1  ;;  %v1180_v16 = vadd.f32 %v1172_v14, %v3064_v46  ;;  %v1187_v55 = vmul.f32 0.7978846, %v1179_v27  ;;  %v1319_v27 = vstv %s2336_s26 }
 0x647   :  { %v1174_v34 = vmul.f32 0.044715, %v1166_v56  ;;  %v1181_v58 = vadd.f32 %v1173_v25, %v3070_v29  ;;  %v1167_v8 = vmul.f32 %v1159_v51, %v3082_v12  ;;  %v1160_v28 = vmul.f32 %v3088_v3, %v3088_v3 }
 0x648   :  { %v1151_v2 = vadd.f32 %v1150_v44, %v1046_v52  ;;  %v1152_v9 = vpop.f32.mrf.mxu1  ;;  %v1188_v54 = vmul.f32 0.7978846, %v1180_v16 }
 0x649   :  { %v1153_v57 = vadd.f32 %v1152_v9, %v1046_v52  ;;  %v1175_v19 = vmul.f32 0.044715, %v1167_v8  ;;  %v1168_v53 = vmul.f32 %v1160_v28, %v3088_v3  ;;  %v1182_v21 = vadd.f32 %v1174_v34, %v3075_v33 }
 0x64a   :  { %v1161_v37 = vmul.f32 %v1151_v2, %v1151_v2  ;;  %v1189_v38 = vmul.f32 0.7978846, %v1181_v58  ;;  %2444 = vtanh.f32 %v1188_v54 }
 0x64b   :  { %v1162_v40 = vmul.f32 %v1153_v57, %v1153_v57  ;;  %v1183_v6 = vadd.f32 %v1175_v19, %v3082_v12  ;;  %v1176_v22 = vmul.f32 0.044715, %v1168_v53  ;;  %v1190_v47 = vmul.f32 0.7978846, %v1182_v21 }
 0x64c   :  { %v1169_v23 = vmul.f32 %v1161_v37, %v1151_v2  ;;  %2446 = vtanh.f32 %v1189_v38 }
 0x64d   :  { %v1170_v24 = vmul.f32 %v1162_v40, %v1153_v57  ;;  %v1191_v36 = vmul.f32 0.7978846, %v1183_v6  ;;  %v1184_v41 = vadd.f32 %v1176_v22, %v3088_v3 }
 0x64e   :  { %v1177_v26 = vmul.f32 0.044715, %v1169_v23 }
 0x64f   :  { %v1178_v45 = vmul.f32 0.044715, %v1170_v24  ;;  %v1192_v50 = vmul.f32 0.7978846, %v1184_v41  ;;  %2448 = vtanh.f32 %v1191_v36  ;;  %v1314_v24 = vstv %s2335_s25 }
 0x650   :  { %v1185_v52 = vadd.f32 %v1177_v26, %v1151_v2 }
 0x651   :  { %v1186_v5 = vadd.f32 %v1178_v45, %v1153_v57  ;;  %2450 = vtanh.f32 %v1192_v50  ;;  %v1328_v45 = vstv %s2347_s27 }
 0x652   :  { %v1193_v18 = vmul.f32 0.7978846, %v1185_v52  ;;  %2452 = vtanh.f32 %v1190_v47 }
 0x653   :  { %v1194_v1 = vmul.f32 0.7978846, %v1186_v5  ;;  %v1329_v5 = vmul.f32 %v3032_v39, %v1328_v45 }
 0x654   :  { %2454 = vtanh.f32 %v1193_v18  ;;  %v1332_v18 = vmul.f32 %v3058_v17, %v1328_v45 }
 0x655   :  { %2456 = vtanh.f32 %v1194_v1 }
 0x656   :  { %2458 = vtanh.f32 %v1187_v55  ;;  %v1330_v55 = vmul.f32 %v3042_v32, %v1328_v45 }
 0x657   :  { %v2445_v20 = vpop.eup %2444 }
 0x658   :  { %v1204_v34 = vadd.f32 1.0, %v2445_v20  ;;  %v1363_v20 = vpop.permute.xlu0 %1362 }
 0x659   :  { %v2447_v43 = vpop.eup %2446 }
 0x65a   :  { %v1205_v51 = vadd.f32 1.0, %v2447_v43  ;;  %v1212_v37 = vmul.f32 0.5, %v1204_v34 }
 0x65c   :  { %v2449_v63 = vpop.eup %2448  ;;  %v1213_v19 = vmul.f32 0.5, %v1205_v51 }
 0x65d   :  { %v1207_v15 = vadd.f32 1.0, %v2449_v63 }
 0x65e   :  { %v2451_v11 = vpop.eup %2450  ;;  %v1221_v38 = vmul.f32 %v1213_v19, %v3070_v29  ;;  %v1306_v29 = vstv %s2331_s3 }
 0x65f   :  { %v2453_v42 = vpop.eup %2452  ;;  %v1208_v59 = vadd.f32 1.0, %v2451_v11  ;;  %v1215_v58 = vmul.f32 0.5, %v1207_v15 }
 0x660   :  { %v1206_v56 = vadd.f32 1.0, %v2453_v42 }
 0x661   :  { %v2455_v60 = vpop.eup %2454  ;;  %v1216_v16 = vmul.f32 0.5, %v1208_v59  ;;  %v1223_v54 = vmul.f32 %v1215_v58, %v3082_v12 }
 0x662   :  { %v2457_v14 = vpop.eup %2456  ;;  %v1209_v7 = vadd.f32 1.0, %v2455_v60  ;;  %v1214_v9 = vmul.f32 0.5, %v1206_v56  ;;  %v1353_v60 = vpop.permute.xlu0 %1352 }
 0x663   :  { %v2459_v13 = vpop.eup %2458  ;;  %v1210_v25 = vadd.f32 1.0, %v2457_v14  ;;  %v1224_v53 = vmul.f32 %v1216_v16, %v3088_v3 }
 0x664   :  { %v1217_v30 = vmul.f32 0.5, %v1209_v7  ;;  %v1203_v8 = vadd.f32 1.0, %v2459_v13  ;;  %v1222_v40 = vmul.f32 %v1214_v9, %v3075_v33  ;;  %v1230_v33 = vpop.permute.xlu1 %1229 }
 0x665   :  { %v1218_v44 = vmul.f32 0.5, %v1210_v25 }
 0x666   :  { %v1225_v35 = vmul.f32 %v1217_v30, %v1151_v2  ;;  %v1211_v21 = vmul.f32 0.5, %v1203_v8 }
 0x667   :  { %v1226_v28 = vmul.f32 %v1218_v44, %v1153_v57  ;;  %v1220_v57 = vmul.f32 %v1212_v37, %v3064_v46  ;;  %v1307_v46 = vmul.f32 %v1306_v29, %v3025_v31 }
 0x668   :  { %v1219_v2 = vmul.f32 %v1211_v21, %v3066_v10  ;;  %v1358_v1 = vpop.permute.xlu1 %1357 }
 0x669   :  { %1259 = vmatprep.subr.mxu0 %v1226_v28 }
 0x66a   :  { %1260 = vmatpush1.msra.mxu0 %v1225_v35 }
 0x66b   :  { %1261 = vmatprep.subr.mxu0 %v1224_v53 }
 0x66c   :  { %1262 = vmatpush1.msra.mxu0 %v1223_v54  ;;  %v1348_v63 = vpop.permute.xlu1 %1347 }
 0x66d   :  { %1263 = vmatprep.subr.mxu0 %v1222_v40 }
 0x66e   :  { %1264 = vmatpush1.msra.mxu0 %v1221_v38 }
 0x66f   :  { %1265 = vmatprep.subr.mxu0 %v1220_v57 }
 0x670   :  { %1266 = vmatpush1.msra.mxu0 %v1219_v2 }
 0x671   :  { %2343 = vmatmul.mubr.msk.f32.vlgmr.msra.gmra.mxu0 %vm281_vm2, %v2742_v48  ;;  %v2344_v48 = vld [vmem:[%s3328_s2 + $0x18] sm:$0xff] }
 0x672   :  { %1447 = vmatprep.mubr.f32.mxu0 %v2549_v0  ;;  %v1320_v26 = vmul.f32 %v2344_v48, %v1319_v27 }
 0x731   :  { %v1301_v12 = vpop.f32.mrf.mxu0 }
 0x732   :  { %v1302_v6 = vadd.f32 %v1301_v12, %v1230_v33 }
 0x733   :  { %v1303_v3 = vpop.f32.mrf.mxu0 }
 0x734   :  { %v1304_v22 = vadd.f32 %v1303_v3, %v1230_v33 }
 0x736   :  { %v1310_v23 = vcombine.low %v1302_v6, %v1304_v22 }
 0x738   :  { %v1312_v10 = vadd.f32 %v1310_v23, %v1307_v46 }
 0x73a   :  { %v1313_v36 = vsub.f32 %v3025_v31, %v1312_v10 }
 0x73c   :  { %v1315_v41 = vmul.f32 %v1314_v24, %v1313_v36 }
 0x73e   :  { %v1316_v47 = vadd.f32 %v1315_v41, %v3025_v31  ;;  %v1331_v31 = vmul.f32 %v3050_v4, %v1328_v45 }
 0x740   :  { %v3115_v50 = vadd.f32 %v1320_v26, %v1316_v47 }
 0x742   :  { %v1366_v52 = vcombine.high %v3115_v50, %v3115_v50 }
 0x744   :  { %2351 = vmatprep.subr.msk.mxu0 %vm110_vm0, %v1366_v52 }
 0x745   :  { %2352 = vmatpush1.msk.msra.mxu0 %vm110_vm0, %v3115_v50 }
 0x746   :  { %2353 = vmatmul.mubr.msk.f32.vlgmr.msra.gmra.mxu0 %vm97_vm1, %v1329_v5 }
 0x747   :  { %1453 = vmatprep.mubr.f32.mxu0 %v2549_v0 }
 0x74a   :  { %2354 = vmatmul.mubr.msk.f32.gmra.mxu0 %vm97_vm1, %v1330_v55 }
 0x74b   :  { %1459 = vmatprep.mubr.f32.mxu0 %v2549_v0 }
 0x74e   :  { %2355 = vmatmul.mubr.msk.f32.gmra.mxu0 %vm97_vm1, %v1331_v31 }
 0x74f   :  { %1465 = vmatprep.mubr.f32.mxu0 %v2549_v0 }
 0x752   :  { %2356 = vmatmul.mubr.msk.f32.gmra.mxu0 %vm97_vm1, %v1332_v18 }
 0x753   :  { %1933 = vmatprep.mubr.f32.mxu0 %v2549_v0 }
 0x806   :  { %v1449_v43 = vpop.f32.mrf.mxu0 }
 0x807   :  { %v3136_v59 = vadd.f32 %v1449_v43, %v1348_v63 }
 0x808   :  { %v1451_v11 = vpop.f32.mrf.mxu0 }
 0x809   :  { %v3134_v42 = vadd.f32 %v1451_v11, %v1348_v63  ;;  %v1472_v51 = vmul.f32 %v3136_v59, %v3136_v59 }
 0x80a   :  { %v1455_v14 = vpop.f32.mrf.mxu0 }
 0x80b   :  { %v1473_v7 = vmul.f32 %v3134_v42, %v3134_v42  ;;  %v3140_v15 = vadd.f32 %v1455_v14, %v1353_v60  ;;  %v1480_v19 = vmul.f32 %v1472_v51, %v3136_v59 }
 0x80c   :  { %v1457_v13 = vpop.f32.mrf.mxu0 }
 0x80d   :  { %v1481_v25 = vmul.f32 %v1473_v7, %v3134_v42  ;;  %v1474_v56 = vmul.f32 %v3140_v15, %v3140_v15  ;;  %v3145_v30 = vadd.f32 %v1457_v13, %v1353_v60  ;;  %v1488_v29 = vmul.f32 0.044715, %v1480_v19 }
 0x80e   :  { %v1461_v44 = vpop.f32.mrf.mxu0 }
 0x80f   :  { %v1489_v16 = vmul.f32 0.044715, %v1481_v25  ;;  %v1482_v34 = vmul.f32 %v1474_v56, %v3140_v15  ;;  %v1475_v58 = vmul.f32 %v3145_v30, %v3145_v30  ;;  %v3152_v8 = vadd.f32 %v1461_v44, %v1358_v1 }
 0x810   :  { %v1463_v28 = vpop.f32.mrf.mxu0  ;;  %v1496_v47 = vadd.f32 %v1488_v29, %v3136_v59 }
 0x811   :  { %v1490_v9 = vmul.f32 0.044715, %v1482_v34  ;;  %v1483_v35 = vmul.f32 %v1475_v58, %v3145_v30  ;;  %v1476_v53 = vmul.f32 %v3152_v8, %v3152_v8  ;;  %v3158_v37 = vadd.f32 %v1463_v28, %v1358_v1 }
 0x812   :  { %v1467_v54 = vpop.f32.mrf.mxu0  ;;  %v1497_v21 = vadd.f32 %v1489_v16, %v3134_v42  ;;  %v1504_v43 = vmul.f32 0.7978846, %v1496_v47 }
 0x813   :  { %v1491_v40 = vmul.f32 0.044715, %v1483_v35  ;;  %v1498_v38 = vadd.f32 %v1490_v9, %v3140_v15  ;;  %v1484_v57 = vmul.f32 %v1476_v53, %v3152_v8  ;;  %v1477_v2 = vmul.f32 %v3158_v37, %v3158_v37 }
 0x814   :  { %v1468_v12 = vadd.f32 %v1467_v54, %v1363_v20  ;;  %v1469_v33 = vpop.f32.mrf.mxu0  ;;  %v1505_v23 = vmul.f32 0.7978846, %v1497_v21 }
 0x815   :  { %v1470_v3 = vadd.f32 %v1469_v33, %v1363_v20  ;;  %v1492_v6 = vmul.f32 0.044715, %v1484_v57  ;;  %v1485_v22 = vmul.f32 %v1477_v2, %v3158_v37  ;;  %v1499_v10 = vadd.f32 %v1491_v40, %v3145_v30 }
 0x816   :  { %v1478_v46 = vmul.f32 %v1468_v12, %v1468_v12  ;;  %v1506_v48 = vmul.f32 0.7978846, %v1498_v38  ;;  %2460 = vtanh.f32 %v1505_v23 }
 0x817   :  { %v1479_v24 = vmul.f32 %v1470_v3, %v1470_v3  ;;  %v1500_v27 = vadd.f32 %v1492_v6, %v3152_v8  ;;  %v1493_v36 = vmul.f32 0.044715, %v1485_v22  ;;  %v1507_v55 = vmul.f32 0.7978846, %v1499_v10 }
 0x818   :  { %v1486_v41 = vmul.f32 %v1478_v46, %v1468_v12  ;;  %2462 = vtanh.f32 %v1506_v48 }
 0x819   :  { %v1487_v26 = vmul.f32 %v1479_v24, %v1470_v3  ;;  %v1508_v45 = vmul.f32 0.7978846, %v1500_v27  ;;  %v1501_v52 = vadd.f32 %v1493_v36, %v3158_v37 }
 0x81a   :  { %v1494_v5 = vmul.f32 0.044715, %v1486_v41  ;;  %v1631_v41 = vstv %s2349_s30 }
 0x81b   :  { %v1495_v31 = vmul.f32 0.044715, %v1487_v26  ;;  %v1509_v18 = vmul.f32 0.7978846, %v1501_v52  ;;  %2464 = vtanh.f32 %v1508_v45  ;;  %v1636_v26 = vstv %s2350_s9 }
 0x81c   :  { %v1502_v1 = vadd.f32 %v1494_v5, %v1468_v12 }
 0x81d   :  { %v1503_v20 = vadd.f32 %v1495_v31, %v1470_v3  ;;  %2466 = vtanh.f32 %v1509_v18 }
 0x81e   :  { %v1510_v63 = vmul.f32 0.7978846, %v1502_v1  ;;  %2468 = vtanh.f32 %v1507_v55  ;;  %v1645_v55 = vstv %s2361_s10 }
 0x81f   :  { %v1511_v11 = vmul.f32 0.7978846, %v1503_v20  ;;  %v1646_v1 = vmul.f32 %v3032_v39, %v1645_v55  ;;  %v1647_v20 = vmul.f32 %v3042_v32, %v1645_v55 }
 0x820   :  { %2470 = vtanh.f32 %v1510_v63 }
 0x821   :  { %2472 = vtanh.f32 %v1511_v11  ;;  %v1680_v11 = vpop.permute.xlu1 %1679 }
 0x822   :  { %2474 = vtanh.f32 %v1504_v43  ;;  %v1649_v43 = vmul.f32 %v3058_v17, %v1645_v55 }
 0x823   :  { %v2461_v60 = vpop.eup %2460 }
 0x824   :  { %v1521_v21 = vadd.f32 1.0, %v2461_v60 }
 0x825   :  { %v2463_v14 = vpop.eup %2462 }
 0x826   :  { %v1522_v19 = vadd.f32 1.0, %v2463_v14  ;;  %v1529_v22 = vmul.f32 0.5, %v1521_v21 }
 0x828   :  { %v2465_v7 = vpop.eup %2464  ;;  %v1530_v29 = vmul.f32 0.5, %v1522_v19 }
 0x829   :  { %v1524_v34 = vadd.f32 1.0, %v2465_v7 }
 0x82a   :  { %v2467_v13 = vpop.eup %2466  ;;  %v1538_v24 = vmul.f32 %v1530_v29, %v3140_v15  ;;  %v1623_v15 = vstv %s2345_s14 }
 0x82b   :  { %v2469_v25 = vpop.eup %2468  ;;  %v1525_v51 = vadd.f32 1.0, %v2467_v13  ;;  %v1532_v40 = vmul.f32 0.5, %v1524_v34 }
 0x82c   :  { %v1523_v9 = vadd.f32 1.0, %v2469_v25  ;;  %v1670_v25 = vpop.permute.xlu1 %1669 }
 0x82d   :  { %v2471_v56 = vpop.eup %2470  ;;  %v1533_v54 = vmul.f32 0.5, %v1525_v51  ;;  %v1540_v46 = vmul.f32 %v1532_v40, %v3152_v8 }
 0x82e   :  { %v2473_v44 = vpop.eup %2472  ;;  %v1526_v16 = vadd.f32 1.0, %v2471_v56  ;;  %v1531_v2 = vmul.f32 0.5, %v1523_v9 }
 0x82f   :  { %v2475_v58 = vpop.eup %2474  ;;  %v1527_v28 = vadd.f32 1.0, %v2473_v44  ;;  %v1541_v6 = vmul.f32 %v1533_v54, %v3158_v37 }
 0x830   :  { %v1534_v35 = vmul.f32 0.5, %v1526_v16  ;;  %v1520_v38 = vadd.f32 1.0, %v2475_v58  ;;  %v1539_v10 = vmul.f32 %v1531_v2, %v3145_v30  ;;  %v1547_v30 = vpop.permute.xlu0 %1546 }
 0x831   :  { %v1535_v53 = vmul.f32 0.5, %v1527_v28 }
 0x832   :  { %v1542_v33 = vmul.f32 %v1534_v35, %v1468_v12  ;;  %v1528_v23 = vmul.f32 0.5, %v1520_v38 }
 0x833   :  { %v1543_v57 = vmul.f32 %v1535_v53, %v1470_v3  ;;  %v1537_v3 = vmul.f32 %v1529_v22, %v3134_v42  ;;  %v1624_v42 = vmul.f32 %v1623_v15, %v3115_v50 }
 0x834   :  { %v1536_v12 = vmul.f32 %v1528_v23, %v3136_v59  ;;  %v1675_v63 = vpop.permute.xlu0 %1674 }
 0x835   :  { %1576 = vmatprep.subr.mxu1 %v1543_v57 }
 0x836   :  { %1577 = vmatpush1.msra.mxu1 %v1542_v33 }
 0x837   :  { %1578 = vmatprep.subr.mxu1 %v1541_v6 }
 0x838   :  { %1579 = vmatpush1.msra.mxu1 %v1540_v46  ;;  %v1665_v14 = vpop.permute.xlu0 %1664 }
 0x839   :  { %1580 = vmatprep.subr.mxu1 %v1539_v10 }
 0x83a   :  { %1581 = vmatpush1.msra.mxu1 %v1538_v24 }
 0x83b   :  { %1582 = vmatprep.subr.mxu1 %v1537_v3 }
 0x83c   :  { %1583 = vmatpush1.msra.mxu1 %v1536_v12 }
 0x83d   :  { %2357 = vmatmul.mubr.msk.f32.vlgmr.msra.gmra.mxu1 %vm281_vm2, %v2747_v49  ;;  %v2358_v49 = vld [vmem:[%s3328_s2 + $0x20] sm:$0xff] }
 0x83e   :  { %1764 = vmatprep.mubr.f32.mxu1 %v2549_v0  ;;  %v1637_v52 = vmul.f32 %v2358_v49, %v1636_v26 }
 0x8fd   :  { %v1618_v8 = vpop.f32.mrf.mxu1 }
 0x8fe   :  { %v1619_v48 = vadd.f32 %v1618_v8, %v1547_v30 }
 0x8ff   :  { %v1620_v37 = vpop.f32.mrf.mxu1 }
 0x900   :  { %v1621_v27 = vadd.f32 %v1620_v37, %v1547_v30 }
 0x902   :  { %v1627_v36 = vcombine.low %v1619_v48, %v1621_v27 }
 0x904   :  { %v1629_v59 = vadd.f32 %v1627_v36, %v1624_v42 }
 0x906   :  { %v1630_v47 = vsub.f32 %v3115_v50, %v1629_v59 }
 0x908   :  { %v1632_v45 = vmul.f32 %v1631_v41, %v1630_v47 }
 0x90a   :  { %v1633_v5 = vadd.f32 %v1632_v45, %v3115_v50  ;;  %v1648_v50 = vmul.f32 %v3050_v4, %v1645_v55 }
 0x90c   :  { %v3185_v31 = vadd.f32 %v1637_v52, %v1633_v5 }
 0x90e   :  { %v1683_v18 = vcombine.high %v3185_v31, %v3185_v31 }
 0x910   :  { %2365 = vmatprep.subr.msk.mxu1 %vm110_vm0, %v1683_v18 }
 0x911   :  { %2366 = vmatpush1.msk.msra.mxu1 %vm110_vm0, %v3185_v31 }
 0x912   :  { %2367 = vmatmul.mubr.msk.f32.vlgmr.msra.gmra.mxu1 %vm97_vm1, %v1646_v1 }
 0x913   :  { %1770 = vmatprep.mubr.f32.mxu1 %v2549_v0 }
 0x916   :  { %2368 = vmatmul.mubr.msk.f32.gmra.mxu1 %vm97_vm1, %v1647_v20 }
 0x917   :  { %1776 = vmatprep.mubr.f32.mxu1 %v2549_v0 }
 0x91a   :  { %2369 = vmatmul.mubr.msk.f32.gmra.mxu1 %vm97_vm1, %v1648_v50 }
 0x91b   :  { %1782 = vmatprep.mubr.f32.mxu1 %v2549_v0 }
 0x91e   :  { %2370 = vmatmul.mubr.msk.f32.gmra.mxu1 %vm97_vm1, %v1649_v43 }
 0x91f   :  { %2250 = vmatprep.mubr.f32.mxu1 %v2549_v0 }
 0x9d2   :  { %v1766_v60 = vpop.f32.mrf.mxu1 }
 0x9d3   :  { %v3206_v56 = vadd.f32 %v1766_v60, %v1665_v14 }
 0x9d4   :  { %v1768_v7 = vpop.f32.mrf.mxu1 }
 0x9d5   :  { %v3204_v13 = vadd.f32 %v1768_v7, %v1665_v14  ;;  %v1789_v35 = vmul.f32 %v3206_v56, %v3206_v56 }
 0x9d6   :  { %v1772_v51 = vpop.f32.mrf.mxu1 }
 0x9d7   :  { %v1790_v44 = vmul.f32 %v3204_v13, %v3204_v13  ;;  %v3210_v16 = vadd.f32 %v1772_v51, %v1670_v25  ;;  %v1797_v33 = vmul.f32 %v1789_v35, %v3206_v56 }
 0x9d8   :  { %v1774_v34 = vpop.f32.mrf.mxu1 }
 0x9d9   :  { %v1798_v58 = vmul.f32 %v1790_v44, %v3204_v13  ;;  %v1791_v28 = vmul.f32 %v3210_v16, %v3210_v16  ;;  %v3215_v9 = vadd.f32 %v1774_v34, %v1670_v25  ;;  %v1805_v37 = vmul.f32 0.044715, %v1797_v33 }
 0x9da   :  { %v1778_v19 = vpop.f32.mrf.mxu1 }
 0x9db   :  { %v1806_v53 = vmul.f32 0.044715, %v1798_v58  ;;  %v1799_v54 = vmul.f32 %v1791_v28, %v3210_v16  ;;  %v1792_v21 = vmul.f32 %v3215_v9, %v3215_v9  ;;  %v3222_v40 = vadd.f32 %v1778_v19, %v1675_v63 }
 0x9dc   :  { %v1780_v38 = vpop.f32.mrf.mxu1  ;;  %v1813_v52 = vadd.f32 %v1805_v37, %v3206_v56 }
 0x9dd   :  { %v1807_v57 = vmul.f32 0.044715, %v1799_v54  ;;  %v1800_v2 = vmul.f32 %v1792_v21, %v3215_v9  ;;  %v1793_v29 = vmul.f32 %v3222_v40, %v3222_v40  ;;  %v3228_v6 = vadd.f32 %v1780_v38, %v1675_v63 }
 0x9de   :  { %v1784_v22 = vpop.f32.mrf.mxu1  ;;  %v1814_v46 = vadd.f32 %v1806_v53, %v3204_v13 }
 0x9df   :  { %v1808_v23 = vmul.f32 0.044715, %v1800_v2  ;;  %v1815_v10 = vadd.f32 %v1807_v57, %v3210_v16  ;;  %v1801_v24 = vmul.f32 %v1793_v29, %v3222_v40  ;;  %v1794_v3 = vmul.f32 %v3228_v6, %v3228_v6 }
 0x9e0   :  { %v1785_v12 = vadd.f32 %v1784_v22, %v1680_v11  ;;  %v1786_v8 = vpop.f32.mrf.mxu1  ;;  %v1822_v42 = vmul.f32 0.7978846, %v1814_v46 }
 0x9e1   :  { %v1787_v30 = vadd.f32 %v1786_v8, %v1680_v11  ;;  %v1809_v15 = vmul.f32 0.044715, %v1801_v24  ;;  %v1802_v48 = vmul.f32 %v1794_v3, %v3228_v6  ;;  %v1816_v36 = vadd.f32 %v1808_v23, %v3215_v9 }
 0x9e2   :  { %v1795_v27 = vmul.f32 %v1785_v12, %v1785_v12  ;;  %v1823_v41 = vmul.f32 0.7978846, %v1815_v10  ;;  %2476 = vtanh.f32 %v1822_v42  ;;  %v1821_v11 = vmul.f32 0.7978846, %v1813_v52 }
 0x9e3   :  { %v1796_v59 = vmul.f32 %v1787_v30, %v1787_v30  ;;  %v1817_v49 = vadd.f32 %v1809_v15, %v3222_v40  ;;  %v1810_v26 = vmul.f32 0.044715, %v1802_v48  ;;  %v1824_v1 = vmul.f32 0.7978846, %v1816_v36 }
 0x9e4   :  { %v1803_v47 = vmul.f32 %v1795_v27, %v1785_v12  ;;  %2478 = vtanh.f32 %v1823_v41 }
 0x9e5   :  { %v1804_v45 = vmul.f32 %v1796_v59, %v1787_v30  ;;  %v1825_v5 = vmul.f32 0.7978846, %v1817_v49  ;;  %v1818_v55 = vadd.f32 %v1810_v26, %v3228_v6  ;;  %v1948_v26 = vstv %s2363_s13 }
 0x9e6   :  { %v1811_v18 = vmul.f32 0.044715, %v1803_v47  ;;  %v1953_v47 = vstv %s2364_s11 }
 0x9e7   :  { %v1812_v20 = vmul.f32 0.044715, %v1804_v45  ;;  %v1826_v50 = vmul.f32 0.7978846, %v1818_v55  ;;  %2480 = vtanh.f32 %v1825_v5 }
 0x9e8   :  { %v1819_v43 = vadd.f32 %v1811_v18, %v1785_v12  ;;  %v1962_v18 = vstv %s2375_s15 }
 0x9e9   :  { %v1820_v63 = vadd.f32 %v1812_v20, %v1787_v30  ;;  %2482 = vtanh.f32 %v1826_v50  ;;  %v1963_v50 = vmul.f32 %v3032_v39, %v1962_v18  ;;  %v1966_v39 = vmul.f32 %v3058_v17, %v1962_v18 }
 0x9ea   :  { %v1827_v60 = vmul.f32 0.7978846, %v1819_v43  ;;  %2484 = vtanh.f32 %v1824_v1  ;;  %v1964_v43 = vmul.f32 %v3042_v32, %v1962_v18 }
 0x9eb   :  { %v1828_v14 = vmul.f32 0.7978846, %v1820_v63 }
 0x9ec   :  { %2486 = vtanh.f32 %v1827_v60 }
 0x9ed   :  { %2488 = vtanh.f32 %v1828_v14 }
 0x9ee   :  { %2490 = vtanh.f32 %v1821_v11  ;;  %v1997_v11 = vpop.permute.xlu0 %1996 }
 0x9ef   :  { %v2477_v7 = vpop.eup %2476 }
 0x9f0   :  { %v1838_v22 = vadd.f32 1.0, %v2477_v7 }
 0x9f1   :  { %v2479_v25 = vpop.eup %2478 }
 0x9f2   :  { %v1839_v2 = vadd.f32 1.0, %v2479_v25  ;;  %v1846_v15 = vmul.f32 0.5, %v1838_v22  ;;  %v1987_v25 = vpop.permute.xlu0 %1986 }
 0x9f4   :  { %v2481_v51 = vpop.eup %2480  ;;  %v1847_v8 = vmul.f32 0.5, %v1839_v2 }
 0x9f5   :  { %v1841_v53 = vadd.f32 1.0, %v2481_v51 }
 0x9f6   :  { %v2483_v44 = vpop.eup %2482  ;;  %v1855_v36 = vmul.f32 %v1847_v8, %v3210_v16  ;;  %v1940_v16 = vstv %s2359_s12 }
 0x9f7   :  { %v2485_v34 = vpop.eup %2484  ;;  %v1842_v28 = vadd.f32 1.0, %v2483_v44  ;;  %v1849_v46 = vmul.f32 0.5, %v1841_v53 }
 0x9f8   :  { %v1840_v38 = vadd.f32 1.0, %v2485_v34 }
 0x9f9   :  { %v2487_v58 = vpop.eup %2486  ;;  %v1850_v29 = vmul.f32 0.5, %v1842_v28  ;;  %v1857_v48 = vmul.f32 %v1849_v46, %v3222_v40 }
 0x9fa   :  { %v2489_v35 = vpop.eup %2488  ;;  %v1843_v19 = vadd.f32 1.0, %v2487_v58  ;;  %v1848_v24 = vmul.f32 0.5, %v1840_v38 }
 0x9fb   :  { %v2491_v54 = vpop.eup %2490  ;;  %v1844_v21 = vadd.f32 1.0, %v2489_v35  ;;  %v1858_v37 = vmul.f32 %v1850_v29, %v3228_v6 }
 0x9fc   :  { %v1851_v57 = vmul.f32 0.5, %v1843_v19  ;;  %v1837_v23 = vadd.f32 1.0, %v2491_v54  ;;  %v1856_v42 = vmul.f32 %v1848_v24, %v3215_v9  ;;  %v1864_v9 = vpop.permute.xlu1 %1863 }
 0x9fd   :  { %v1852_v33 = vmul.f32 0.5, %v1844_v21 }
 0x9fe   :  { %v1859_v3 = vmul.f32 %v1851_v57, %v1785_v12  ;;  %v1845_v27 = vmul.f32 0.5, %v1837_v23 }
 0x9ff   :  { %v1860_v10 = vmul.f32 %v1852_v33, %v1787_v30  ;;  %v1854_v30 = vmul.f32 %v1846_v15, %v3204_v13  ;;  %v1941_v13 = vmul.f32 %v1940_v16, %v3185_v31 }
 0xa00   :  { %v1853_v12 = vmul.f32 %v1845_v27, %v3206_v56  ;;  %v1992_v63 = vpop.permute.xlu1 %1991 }
 0xa01   :  { %1893 = vmatprep.subr.mxu0 %v1860_v10 }
 0xa02   :  { %1894 = vmatpush1.msra.mxu0 %v1859_v3 }
 0xa03   :  { %1895 = vmatprep.subr.mxu0 %v1858_v37 }
 0xa04   :  { %1896 = vmatpush1.msra.mxu0 %v1857_v48  ;;  %v1982_v32 = vpop.permute.xlu1 %1981 }
 0xa05   :  { %1897 = vmatprep.subr.mxu0 %v1856_v42 }
 0xa06   :  { %1898 = vmatpush1.msra.mxu0 %v1855_v36 }
 0xa07   :  { %1899 = vmatprep.subr.mxu0 %v1854_v30 }
 0xa08   :  { %1900 = vmatpush1.msra.mxu0 %v1853_v12 }
 0xa09   :  { %2371 = vmatmul.mubr.msk.f32.vlgmr.msra.gmra.mxu0 %vm281_vm2, %v2764_v61  ;;  %v2372_v61 = vld [vmem:[%s3328_s2 + $0x28] sm:$0xff] }
 0xa0a   :  { %2081 = vmatprep.mubr.f32.mxu0 %v2549_v0  ;;  %v1954_v5 = vmul.f32 %v2372_v61, %v1953_v47 }
 0xac9   :  { %v1935_v40 = vpop.f32.mrf.mxu0 }
 0xaca   :  { %v1936_v59 = vadd.f32 %v1935_v40, %v1864_v9 }
 0xacb   :  { %v1937_v6 = vpop.f32.mrf.mxu0 }
 0xacc   :  { %v1938_v41 = vadd.f32 %v1937_v6, %v1864_v9 }
 0xace   :  { %v1944_v49 = vcombine.low %v1936_v59, %v1938_v41 }
 0xad0   :  { %v1946_v56 = vadd.f32 %v1944_v49, %v1941_v13 }
 0xad2   :  { %v1947_v45 = vsub.f32 %v3185_v31, %v1946_v56 }
 0xad4   :  { %v1949_v52 = vmul.f32 %v1948_v26, %v1947_v45 }
 0xad6   :  { %v1950_v55 = vadd.f32 %v1949_v52, %v3185_v31  ;;  %v1965_v31 = vmul.f32 %v3050_v4, %v1962_v18 }
 0xad8   :  { %v3255_v1 = vadd.f32 %v1954_v5, %v1950_v55 }
 0xada   :  { %v2000_v20 = vcombine.high %v3255_v1, %v3255_v1 }
 0xadc   :  { %2379 = vmatprep.subr.msk.mxu0 %vm110_vm0, %v2000_v20 }
 0xadd   :  { %2380 = vmatpush1.msk.msra.mxu0 %vm110_vm0, %v3255_v1 }
 0xade   :  { %2381 = vmatmul.mubr.msk.f32.vlgmr.msra.gmra.mxu0 %vm97_vm1, %v1963_v50 }
 0xadf   :  { %2087 = vmatprep.mubr.f32.mxu0 %v2549_v0 }
 0xae2   :  { %2382 = vmatmul.mubr.msk.f32.gmra.mxu0 %vm97_vm1, %v1964_v43 }
 0xae3   :  { %2093 = vmatprep.mubr.f32.mxu0 %v2549_v0 }
 0xae6   :  { %2383 = vmatmul.mubr.msk.f32.gmra.mxu0 %vm97_vm1, %v1965_v31 }
 0xae7   :  { %2099 = vmatprep.mubr.f32.mxu0 %v2549_v0 }
 0xaea   :  { %2384 = vmatmul.mubr.msk.f32.gmra.mxu0 %vm97_vm1, %v1966_v39 }
 0xb9e   :  { %v2083_v60 = vpop.f32.mrf.mxu0 }
 0xb9f   :  { %v3275_v51 = vadd.f32 %v2083_v60, %v1982_v32 }
 0xba0   :  { %v2085_v14 = vpop.f32.mrf.mxu0 }
 0xba1   :  { %v3273_v7 = vadd.f32 %v2085_v14, %v1982_v32  ;;  %v2106_v35 = vmul.f32 %v3275_v51, %v3275_v51 }
 0xba2   :  { %v2089_v4 = vpop.f32.mrf.mxu0 }
 0xba3   :  { %v2107_v44 = vmul.f32 %v3273_v7, %v3273_v7  ;;  %v3279_v34 = vadd.f32 %v2089_v4, %v1987_v25  ;;  %v2114_v29 = vmul.f32 %v2106_v35, %v3275_v51 }
 0xba4   :  { %v2091_v17 = vpop.f32.mrf.mxu0 }
 0xba5   :  { %v2115_v0 = vmul.f32 %v2107_v44, %v3273_v7  ;;  %v2108_v58 = vmul.f32 %v3279_v34, %v3279_v34  ;;  %v3284_v28 = vadd.f32 %v2091_v17, %v1987_v25  ;;  %v2122_v42 = vmul.f32 0.044715, %v2114_v29 }
 0xba6   :  { %v2095_v19 = vpop.f32.mrf.mxu0 }
 0xba7   :  { %v2123_v53 = vmul.f32 0.044715, %v2115_v0  ;;  %v2116_v54 = vmul.f32 %v2108_v58, %v3279_v34  ;;  %v2109_v21 = vmul.f32 %v3284_v28, %v3284_v28  ;;  %v3291_v38 = vadd.f32 %v2095_v19, %v1992_v63 }
 0xba8   :  { %v2097_v57 = vpop.f32.mrf.mxu0  ;;  %v2130_v56 = vadd.f32 %v2122_v42, %v3275_v51  ;;  %v2257_v42 = vstv %s2373_s18 }
 0xba9   :  { %v2124_v2 = vmul.f32 0.044715, %v2116_v54  ;;  %v2117_v33 = vmul.f32 %v2109_v21, %v3284_v28  ;;  %v2110_v22 = vmul.f32 %v3291_v38, %v3291_v38  ;;  %v3297_v46 = vadd.f32 %v2097_v57, %v1992_v63 }
 0xbaa   :  { %v2101_v23 = vpop.f32.mrf.mxu0  ;;  %v2131_v10 = vadd.f32 %v2123_v53, %v3273_v7  ;;  %v2138_v20 = vmul.f32 0.7978846, %v2130_v56 }
 0xbab   :  { %v2125_v24 = vmul.f32 0.044715, %v2117_v33  ;;  %v2132_v3 = vadd.f32 %v2124_v2, %v3279_v34  ;;  %v2118_v8 = vmul.f32 %v2110_v22, %v3291_v38  ;;  %v2111_v37 = vmul.f32 %v3297_v46, %v3297_v46 }
 0xbac   :  { %v2102_v15 = vadd.f32 %v2101_v23, %v1997_v11  ;;  %v2103_v48 = vpop.f32.mrf.mxu0  ;;  %v2139_v40 = vmul.f32 0.7978846, %v2131_v10 }
 0xbad   :  { %v2104_v27 = vadd.f32 %v2103_v48, %v1997_v11  ;;  %v2126_v36 = vmul.f32 0.044715, %v2118_v8  ;;  %v2119_v30 = vmul.f32 %v2111_v37, %v3297_v46  ;;  %v2133_v9 = vadd.f32 %v2125_v24, %v3284_v28 }
 0xbae   :  { %v2112_v12 = vmul.f32 %v2102_v15, %v2102_v15  ;;  %v2140_v16 = vmul.f32 0.7978846, %v2132_v3  ;;  %2492 = vtanh.f32 %v2139_v40  ;;  %v2265_v40 = vstv %s2377_s1 }
 0xbaf   :  { %v2113_v6 = vmul.f32 %v2104_v27, %v2104_v27  ;;  %v2134_v59 = vadd.f32 %v2126_v36, %v3291_v38  ;;  %v2127_v41 = vmul.f32 0.044715, %v2119_v30  ;;  %v2141_v45 = vmul.f32 0.7978846, %v2133_v9 }
 0xbb0   :  { %v2120_v13 = vmul.f32 %v2112_v12, %v2102_v15  ;;  %2494 = vtanh.f32 %v2140_v16  ;;  %v2258_v30 = vmul.f32 %v2257_v42, %v3255_v1  ;;  %v2270_v9 = vstv %s2378_s4 }
 0xbb1   :  { %v2121_v49 = vmul.f32 %v2113_v6, %v2104_v27  ;;  %v2142_v26 = vmul.f32 0.7978846, %v2134_v59  ;;  %v2135_v61 = vadd.f32 %v2127_v41, %v3297_v46 }
 0xbb2   :  { %v2128_v47 = vmul.f32 0.044715, %v2120_v13 }
 0xbb3   :  { %v2129_v52 = vmul.f32 0.044715, %v2121_v49  ;;  %v2143_v5 = vmul.f32 0.7978846, %v2135_v61  ;;  %2496 = vtanh.f32 %v2142_v26 }
 0xbb4   :  { %v2136_v55 = vadd.f32 %v2128_v47, %v2102_v15 }
 0xbb5   :  { %v2137_v18 = vadd.f32 %v2129_v52, %v2104_v27  ;;  %2498 = vtanh.f32 %v2143_v5 }
 0xbb6   :  { %v2144_v50 = vmul.f32 0.7978846, %v2136_v55  ;;  %2500 = vtanh.f32 %v2141_v45 }
 0xbb7   :  { %v2145_v43 = vmul.f32 0.7978846, %v2137_v18 }
 0xbb8   :  { %2502 = vtanh.f32 %v2144_v50 }
 0xbb9   :  { %2504 = vtanh.f32 %v2145_v43 }
 0xbba   :  { %2506 = vtanh.f32 %v2138_v20 }
 0xbbb   :  { %v2493_v31 = vpop.eup %2492 }
 0xbbc   :  { %v2155_v21 = vadd.f32 1.0, %v2493_v31 }
 0xbbd   :  { %v2495_v39 = vpop.eup %2494 }
 0xbbe   :  { %v2156_v19 = vadd.f32 1.0, %v2495_v39  ;;  %v2163_v24 = vmul.f32 0.5, %v2155_v21 }
 0xbc0   :  { %v2497_v63 = vpop.eup %2496  ;;  %v2164_v23 = vmul.f32 0.5, %v2156_v19 }
 0xbc1   :  { %v2158_v44 = vadd.f32 1.0, %v2497_v63 }
 0xbc2   :  { %v2499_v11 = vpop.eup %2498  ;;  %v2172_v48 = vmul.f32 %v2164_v23, %v3279_v34 }
 0xbc3   :  { %v2501_v60 = vpop.eup %2500  ;;  %v2159_v14 = vadd.f32 1.0, %v2499_v11  ;;  %v2166_v57 = vmul.f32 0.5, %v2158_v44 }
 0xbc4   :  { %v2157_v58 = vadd.f32 1.0, %v2501_v60 }
 0xbc5   :  { %v2503_v32 = vpop.eup %2502  ;;  %v2167_v54 = vmul.f32 0.5, %v2159_v14  ;;  %v2174_v3 = vmul.f32 %v2166_v57, %v3291_v38 }
 0xbc6   :  { %v2505_v25 = vpop.eup %2504  ;;  %v2160_v4 = vadd.f32 1.0, %v2503_v32  ;;  %v2165_v29 = vmul.f32 0.5, %v2157_v58 }
 0xbc7   :  { %v2507_v17 = vpop.eup %2506  ;;  %v2161_v0 = vadd.f32 1.0, %v2505_v25  ;;  %v2175_v10 = vmul.f32 %v2167_v54, %v3297_v46  ;;  %v2181_v46 = vpop.permute.xlu0 %2180 }
 0xbc8   :  { %v2168_v35 = vmul.f32 0.5, %v2160_v4  ;;  %v2154_v2 = vadd.f32 1.0, %v2507_v17  ;;  %v2173_v37 = vmul.f32 %v2165_v29, %v3284_v28 }
 0xbc9   :  { %v2169_v53 = vmul.f32 0.5, %v2161_v0 }
 0xbca   :  { %v2176_v22 = vmul.f32 %v2168_v35, %v2102_v15  ;;  %v2162_v8 = vmul.f32 0.5, %v2154_v2 }
 0xbcb   :  { %v2177_v33 = vmul.f32 %v2169_v53, %v2104_v27  ;;  %v2171_v27 = vmul.f32 %v2163_v24, %v3273_v7 }
 0xbcc   :  { %v2170_v15 = vmul.f32 %v2162_v8, %v3275_v51  ;;  %v2386_v51 = vld [vmem:[%s3328_s2 + $0x30] sm:$0xff] }
 0xbcd   :  { %2210 = vmatprep.subr.mxu1 %v2177_v33  ;;  %v2271_v16 = vmul.f32 %v2386_v51, %v2270_v9 }
 0xbce   :  { %2211 = vmatpush1.msra.mxu1 %v2176_v22 }
 0xbcf   :  { %2212 = vmatprep.subr.mxu1 %v2175_v10 }
 0xbd0   :  { %2213 = vmatpush1.msra.mxu1 %v2174_v3 }
 0xbd1   :  { %2214 = vmatprep.subr.mxu1 %v2173_v37 }
 0xbd2   :  { %2215 = vmatpush1.msra.mxu1 %v2172_v48 }
 0xbd3   :  { %2216 = vmatprep.subr.mxu1 %v2171_v27 }
 0xbd4   :  { %2217 = vmatpush1.msra.mxu1 %v2170_v15 }
 0xbd5   :  { %2385 = vmatmul.mubr.msk.f32.vlgmr.msra.gmra.mxu1 %vm281_vm2, %v2769_v62 }
 0xc95   :  { %v2252_v38 = vpop.f32.mrf.mxu1 }
 0xc96   :  { %v2253_v36 = vadd.f32 %v2252_v38, %v2181_v46 }
 0xc97   :  { %v2254_v28 = vpop.f32.mrf.mxu1 }
 0xc98   :  { %v2255_v34 = vadd.f32 %v2254_v28, %v2181_v46 }
 0xc9a   :  { %v2261_v7 = vcombine.low %v2253_v36, %v2255_v34 }
 0xc9c   :  { %v2263_v12 = vadd.f32 %v2261_v7, %v2258_v30 }
 0xc9e   :  { %v2264_v62 = vsub.f32 %v3255_v1, %v2263_v12 }
 0xca0   :  { %v2266_v6 = vmul.f32 %v2265_v40, %v2264_v62 }
 0xca2   :  { %v2267_v59 = vadd.f32 %v2266_v6, %v3255_v1 }
 0xca4   :  { %v2272_v41 = vadd.f32 %v2271_v16, %v2267_v59 }
 0xca6   :  { %v2387_v13 = vclamps-f32 %v2272_v41, 1.0 }
 0xca8   :  { %2275 = vst [vmem:[#allocation4] sm:$0xff] %v2387_v13 }
 0xca9   :  { %2535 = shalt.err (!%p2532_p9)
}
 0xcaa   :  { %2285 = dma.vmem_to_hbm [thread:$0]  %s2283_s19, 128, %s3334_s8, [#allocation5]  }
 0xcab   :  { %2546 = dma.done.wait [#allocation5], 128  }
 0xcac   :  { %2547 = vsyncadd [#allocation5], 4294967168 }
 0xcad   :  { %2289 = vsyncpa [#allocation5], 1 }

</bundles_post_ra>
